<compile_context>
chip_gen: v5e
topology: v5e:2x2
jax: 0.10.0
libtpu: 0.0.40
codegen_flags: <defaults>
</compile_context>

<pallas_src>
import jax
import jax.numpy as jnp
import numpy as np
from jax import lax
from jax.experimental import pallas as pl
from jax.experimental.pallas import tpu as pltpu


# -------------------- math helpers (shared by kernel & reference) ------------

def _softplus(x):
    # matches torch.nn.Softplus(beta=1), numerically stable form
    return jnp.maximum(x, 0.0) + jnp.log(1.0 + jnp.exp(-jnp.abs(x)))


def _round_up(x, m):
    return (x + m - 1) // m * m


_MLP_ORDER = ("block_edge", "block_node", "block_attr",
              "conv_edge", "conv_node", "conv_attr")


# -------------------- host-side weight packing --------------------------------

def _pack_params(params):
    """Pack every (W, b) into two lane-padded f32 arrays + static slice metadata."""
    w_rows, b_rows = [], []
    meta = {}
    woff = 0
    bidx = 0
    for key in _MLP_ORDER:
        entries = []
        for (w, b) in params[key]:
            din, dout = int(w.shape[0]), int(w.shape[1])
            assert dout <= 128, "packed layout assumes hidden width <= 128"
            row_pad = (-din) % 8
            w_rows.append(jnp.pad(jnp.asarray(w, jnp.float32),
                                  ((0, row_pad), (0, 128 - dout))))
            b_rows.append(jnp.pad(jnp.asarray(b, jnp.float32).reshape(1, dout),
                                  ((0, 0), (0, 128 - dout))))
            entries.append((woff, din, dout, bidx))
            woff += din + row_pad
            bidx += 1
        meta[key] = tuple(entries)
    wpack = jnp.concatenate(w_rows, axis=0)           # [R, 128]
    bpack = jnp.concatenate(b_rows, axis=0)           # [n_layers, 128]
    brow_pad = (-bpack.shape[0]) % 8
    if brow_pad:
        bpack = jnp.pad(bpack, ((0, brow_pad), (0, 0)))
    return wpack, bpack, meta


# -------------------- Pallas kernel --------------------------------------------

def _build_kernel(meta, E, N, N_pad, F, tile_e):
    be, bn, ba = meta["block_edge"], meta["block_node"], meta["block_attr"]
    ce, cn, ca = meta["conv_edge"], meta["conv_node"], meta["conv_attr"]
    out_dim = ce[-1][2]          # last conv hidden = 32
    # h0 = ce[0][2]  (first conv hidden) — used only for scratch sizing in wrapper

    def kernel(src_ref, dst_ref, dstT_ref,                  # index tiles (VMEM int32)
               ef_ref, nf_ref, ga_ref, wp_ref, bp_ref,      # feature / weight inputs
               out_e_ref, out_n_ref, out_a_ref,             # outputs
               vdense_ref, vps_ref, vpd_ref,                # per-node precompute
               urow_ref, brow_ref,                          # hoisted graph-attr rows
               msum_ref, deg_ref):                          # per-node accumulators

        def W(entry, r0=0, rn=None):
            off, din, dout, _ = entry
            rn = (din - r0) if rn is None else rn
            return wp_ref[off + r0: off + r0 + rn, :dout]   # static slices

        def B(entry):
            _, _, dout, bidx = entry
            return bp_ref[bidx: bidx + 1, :dout]

        def dense(x, entry):
            return _softplus(
                jnp.dot(x, W(entry), preferred_element_type=jnp.float32) + B(entry))

        def mlp(x, entries):
            for entry in entries:
                x = dense(x, entry)
            return x

        step = pl.program_id(0)
        base = step * tile_e
        ce0, cn0, ca0 = ce[0], cn[0], ca[0]

        # ---- step 0: node-side dense MLP, pre-projection, hoisted graph-attr ---
        @pl.when(step == 0)
        def _init():
            v_d = mlp(nf_ref[...], bn)                       # block_node MLP [N_pad, F]
            vdense_ref[...] = v_d
            # pre-project node features with the vi / vj row-blocks of conv_edge W0
            vps_ref[...] = jnp.dot(v_d, W(ce0, 0, F),
                                   preferred_element_type=jnp.float32)
            vpd_ref[...] = jnp.dot(v_d, W(ce0, F, F),
                                   preferred_element_type=jnp.float32)
            u_d = mlp(ga_ref[...], ba)                       # block_attr MLP [1, F]
            urow_ref[...] = u_d
            # graph-attr term of conv_edge first layer folded into one bias row
            brow_ref[...] = (jnp.dot(u_d, W(ce0, 3 * F, F),
                                     preferred_element_type=jnp.float32) + B(ce0))
            msum_ref[...] = jnp.zeros_like(msum_ref)
            deg_ref[...] = jnp.zeros_like(deg_ref)

        # ---- vectorized endpoint gather via one-hot MXU matmuls ----------------
        src_col = src_ref[...]                               # [tile_e, 1] int32
        dst_col = dst_ref[...]                               # [tile_e, 1] int32
        iota_n = lax.broadcasted_iota(jnp.int32, (tile_e, N_pad), 1)
        onehot_src = (iota_n == src_col).astype(jnp.float32)
        onehot_dst = (iota_n == dst_col).astype(jnp.float32)

        # ---- edge update: block-dense MLP + conv_edge MLP ----------------------
        e0 = ef_ref[...]                                     # [tile_e, F] originals
        e_d = mlp(e0, be)                                    # block_edge dense MLP

        h = (jnp.dot(onehot_src, vps_ref[...], preferred_element_type=jnp.float32)
             + jnp.dot(onehot_dst, vpd_ref[...], preferred_element_type=jnp.float32)
             + jnp.dot(e_d, W(ce0, 2 * F, F), preferred_element_type=jnp.float32)
             + brow_ref[...])
        m = mlp(_softplus(h), ce[1:])                        # [tile_e, out_dim]

        out_e_ref[...] = m + e0                              # skip connection

        # ---- vectorized scatter-add of messages + in-degree --------------------
        dst_row = dstT_ref[0]                                # [1, tile_e] int32
        iota_nT = lax.broadcasted_iota(jnp.int32, (N_pad, tile_e), 0)
        valid_row = ((lax.broadcasted_iota(jnp.int32, (1, tile_e), 1) + base)
                     < E).astype(jnp.float32)                # masks edge padding
        scatter = (iota_nT == dst_row).astype(jnp.float32) * valid_row
        msum_ref[...] += jnp.dot(scatter, m, preferred_element_type=jnp.float32)
        deg_ref[...] += jnp.sum(scatter, axis=1, keepdims=True)

        # ---- last step: node update + graph-attr update ------------------------
        @pl.when(step == pl.num_programs(0) - 1)
        def _finalize():
            deg = jnp.maximum(deg_ref[...], 1.0)             # [N_pad, 1]
            ve = msum_ref[...] / deg                         # exact mean over in-edges

            v_d = vdense_ref[...]
            u_d = urow_ref[...]
            hn = (jnp.dot(v_d, W(cn0, 0, F), preferred_element_type=jnp.float32)
                  + jnp.dot(ve, W(cn0, F, out_dim), preferred_element_type=jnp.float32)
                  + jnp.dot(u_d, W(cn0, F + out_dim, F), preferred_element_type=jnp.float32)
                  + B(cn0))
            v_new = mlp(_softplus(hn), cn[1:])               # [N_pad, out_dim]
            out_n_ref[...] = v_new + nf_ref[...]

            nvalid = (lax.broadcasted_iota(jnp.int32, (N_pad, 1), 0)
                      < N).astype(jnp.float32)               # masks node padding
            # sum over nodes of msum == sum over all (valid) edges of m
            ue = jnp.sum(msum_ref[...], axis=0, keepdims=True) * (1.0 / E)
            uv = jnp.sum(v_new * nvalid, axis=0, keepdims=True) * (1.0 / N)
            ha = (jnp.dot(u_d, W(ca0, 0, F), preferred_element_type=jnp.float32)
                  + jnp.dot(ue, W(ca0, F, out_dim), preferred_element_type=jnp.float32)
                  + jnp.dot(uv, W(ca0, F + out_dim, out_dim), preferred_element_type=jnp.float32)
                  + B(ca0))
            u_new = mlp(_softplus(ha), ca[1:])
            out_a_ref[...] = u_new + ga_ref[...]

    return kernel


# -------------------- wrapper ----------------------------------------------------

def megnet_block_forward(edge_feat, node_feat, graph_attr, src_idx, dst_idx,
                         params, *, tile_e=1024):
    E, F = int(edge_feat.shape[0]), int(edge_feat.shape[1])
    N = int(node_feat.shape[0])
    assert E > 0 and N > 0, "empty graph not supported (guards the /E, /N means)"
    assert int(graph_attr.shape[0]) == 1, "single-graph block"
    out_dim = int(params["conv_edge"][-1][0].shape[1])
    assert out_dim == F, "skip connection requires conv out_dim == feature dim"

    tile_e = max(8, _round_up(int(tile_e), 8))
    tile_e = min(tile_e, _round_up(E, 8))
    e_pad = _round_up(E, tile_e)
    nsteps = e_pad // tile_e
    N_pad = _round_up(N, 8)

    ef = jnp.pad(jnp.asarray(edge_feat, jnp.float32), ((0, e_pad - E), (0, 0)))
    nf = jnp.pad(jnp.asarray(node_feat, jnp.float32), ((0, N_pad - N), (0, 0)))
    ga = jnp.asarray(graph_attr, jnp.float32)
    src = jnp.pad(jnp.asarray(src_idx, jnp.int32), (0, e_pad - E))   # pad with 0 (in range)
    dst = jnp.pad(jnp.asarray(dst_idx, jnp.int32), (0, e_pad - E))
    src_col = src.reshape(e_pad, 1)
    dst_col = dst.reshape(e_pad, 1)
    dst_row3 = dst.reshape(nsteps, 1, tile_e)

    wpack, bpack, meta = _pack_params(params)
    h0 = meta["conv_edge"][0][2]

    kernel = _build_kernel(meta, E, N, N_pad, F, tile_e)

    grid_spec = pltpu.PrefetchScalarGridSpec(
        num_scalar_prefetch=0,
        grid=(nsteps,),
        in_specs=[
            pl.BlockSpec((tile_e, 1), lambda i: (i, 0)),        # src indices (column)
            pl.BlockSpec((tile_e, 1), lambda i: (i, 0)),        # dst indices (column)
            pl.BlockSpec((1, 1, tile_e), lambda i: (i, 0, 0)),  # dst indices (row)
            pl.BlockSpec((tile_e, F), lambda i: (i, 0)),        # edge tile (pipelined)
            pl.BlockSpec((N_pad, F), lambda i: (0, 0)),         # node feats (resident)
            pl.BlockSpec((1, F), lambda i: (0, 0)),             # graph attr
            pl.BlockSpec(wpack.shape, lambda i: (0, 0)),        # packed weights
            pl.BlockSpec(bpack.shape, lambda i: (0, 0)),        # packed biases
        ],
        out_specs=[
            pl.BlockSpec((tile_e, out_dim), lambda i: (i, 0)),
            pl.BlockSpec((N_pad, out_dim), lambda i: (0, 0)),
            pl.BlockSpec((1, out_dim), lambda i: (0, 0)),
        ],
        scratch_shapes=[
            pltpu.VMEM((N_pad, F), jnp.float32),            # dense node feats
            pltpu.VMEM((N_pad, h0), jnp.float32),           # v @ W0[vi rows]
            pltpu.VMEM((N_pad, h0), jnp.float32),           # v @ W0[vj rows]
            pltpu.VMEM((1, F), jnp.float32),                # block_attr(u)
            pltpu.VMEM((1, h0), jnp.float32),               # folded conv_edge bias row
            pltpu.VMEM((N_pad, out_dim), jnp.float32),      # per-node sum of messages
            pltpu.VMEM((N_pad, 1), jnp.float32),            # per-node in-degree
        ],
    )

    # ---- generation-aware VMEM budget (leave headroom, esp. on v7x 64 MiB) ----
    def _bytes(*shapes):
        return 4 * sum(int(np.prod(s)) for s in shapes)

    est = (
        2 * _bytes((tile_e, F), (tile_e, out_dim),
                   (tile_e, 128), (tile_e, 128), (8, tile_e))      # double-buffered tiles
        + _bytes((N_pad, F), (8, 128), wpack.shape, bpack.shape,
                 (N_pad, out_dim), (8, 128))                       # resident in/out
        + _bytes((N_pad, F), (N_pad, h0), (N_pad, h0),
                 (8, 128), (8, 128), (N_pad, out_dim), (N_pad, 128))  # scratch
    )
    try:
        info = pltpu.get_tpu_info()
        phys = int(getattr(info, "vmem_capacity_bytes", 64 * 2 ** 20))
    except Exception:
        phys = 64 * 2 ** 20
    cap = (phys * 3) // 4
    vmem_limit = int(min(cap, max(32 * 2 ** 20, 3 * est)))

    out_shape = (
        jax.ShapeDtypeStruct((e_pad, out_dim), jnp.float32),
        jax.ShapeDtypeStruct((N_pad, out_dim), jnp.float32),
        jax.ShapeDtypeStruct((1, out_dim), jnp.float32),
    )

    out_e, out_n, out_a = pl.pallas_call(
        kernel,
        out_shape=out_shape,
        grid_spec=grid_spec,
        compiler_params=pltpu.CompilerParams(
            dimension_semantics=("arbitrary",),    # edge axis carries the accumulators
            vmem_limit_bytes=vmem_limit,
        ),
    )(src_col, dst_col, dst_row3, ef, nf, ga, wpack, bpack)

    return out_e[:E], out_n[:N], out_a


# -------------------- pure-JAX reference ------------------------------------------

def megnet_block_reference(edge_feat, node_feat, graph_attr, src_idx, dst_idx, params):
    def mlp(x, layers):
        for w, b in layers:
            x = _softplus(jnp.dot(x, w, precision=jax.lax.Precision.HIGHEST) + b)
        return x

    e0, v0, u0 = edge_feat, node_feat, graph_attr
    e = mlp(e0, params["block_edge"])
    v = mlp(v0, params["block_node"])
    u = mlp(u0, params["block_attr"])

    E, N = e0.shape[0], v0.shape[0]
    vi, vj = v[src_idx], v[dst_idx]
    u_e = jnp.broadcast_to(u, (E, u.shape[1]))
    m = mlp(jnp.concatenate([vi, vj, e, u_e], axis=1), params["conv_edge"])

    ve_sum = jnp.zeros((N, m.shape[1]), jnp.float32).at[dst_idx].add(m)
    deg = jnp.maximum(jnp.zeros((N, 1), jnp.float32).at[dst_idx].add(1.0), 1.0)
    ve = ve_sum / deg
    u_n = jnp.broadcast_to(u, (N, u.shape[1]))
    v_new = mlp(jnp.concatenate([v, ve, u_n], axis=1), params["conv_node"])

    ue = jnp.mean(m, axis=0, keepdims=True)
    uv = jnp.mean(v_new, axis=0, keepdims=True)
    u_new = mlp(jnp.concatenate([u, ue, uv], axis=1), params["conv_attr"])

    return m + e0, v_new + v0, u_new + u0


# -------------------- deterministic parameter init --------------------------------

def _init_mlp(key, dims):
    layers = []
    for i in range(len(dims) - 1):
        key, kw, kb = jax.random.split(key, 3)
        w = 0.1 * jax.random.normal(kw, (dims[i], dims[i + 1]), jnp.float32)
        b = 0.01 * jax.random.normal(kb, (1, dims[i + 1]), jnp.float32)
        layers.append((w, b))
    return layers, key


if __name__ == "__main__":
    key = jax.random.PRNGKey(0)

    # module hyper-parameters
    F = 32                       # conv_dim = dims[-1]
    dims = [F, F]                # block dense MLP dims
    conv_hiddens = [64, 64, 32]  # out_dim = 32 (must equal F for the skip add)
    out_dim = conv_hiddens[-1]

    # small synthetic graph (E chosen so the kernel exercises multiple edge tiles
    # plus masked padding when tile_e=8)
    N, E = 8, 20
    src_idx = jnp.asarray(np.arange(E) % N, jnp.int32)
    dst_idx = jnp.asarray((np.arange(E) * 3 + 1) % N, jnp.int32)

    # parameters (deterministic).  Input orders: conv_edge=[vi,vj,e,u],
    # conv_node=[v,ve,u], conv_attr=[u,ue,uv].
    params = {}
    params["block_edge"], key = _init_mlp(key, dims)
    params["block_node"], key = _init_mlp(key, dims)
    params["block_attr"], key = _init_mlp(key, dims)
    params["conv_edge"], key = _init_mlp(key, [4 * F] + conv_hiddens)
    params["conv_node"], key = _init_mlp(key, [F + out_dim + F] + conv_hiddens)
    params["conv_attr"], key = _init_mlp(key, [F + out_dim + out_dim] + conv_hiddens)

    # inputs
    key, k1, k2, k3 = jax.random.split(key, 4)
    edge_feat = jax.random.normal(k1, (E, F), jnp.float32)
    node_feat = jax.random.normal(k2, (N, F), jnp.float32)
    graph_attr = jax.random.normal(k3, (1, F), jnp.float32)

    ref_e, ref_n, ref_a = megnet_block_reference(
        edge_feat, node_feat, graph_attr, src_idx, dst_idx, params
    )

    # multi-tile path (3 edge tiles + 4 masked padded edges)
    out_e, out_n, out_a = jax.block_until_ready(
        megnet_block_forward(edge_feat, node_feat, graph_attr,
                             src_idx, dst_idx, params, tile_e=8)
    )
    np.testing.assert_allclose(np.asarray(out_e), np.asarray(ref_e), rtol=2e-3, atol=2e-3)
    np.testing.assert_allclose(np.asarray(out_n), np.asarray(ref_n), rtol=2e-3, atol=2e-3)
    np.testing.assert_allclose(np.asarray(out_a), np.asarray(ref_a), rtol=2e-3, atol=2e-3)

    # default (single large tile) path
    out_e2, out_n2, out_a2 = jax.block_until_ready(
        megnet_block_forward(edge_feat, node_feat, graph_attr,
                             src_idx, dst_idx, params)
    )
    np.testing.assert_allclose(np.asarray(out_e2), np.asarray(ref_e), rtol=2e-3, atol=2e-3)
    np.testing.assert_allclose(np.asarray(out_n2), np.asarray(ref_n), rtol=2e-3, atol=2e-3)
    np.testing.assert_allclose(np.asarray(out_a2), np.asarray(ref_a), rtol=2e-3, atol=2e-3)

    print("KERNEL_OK")
</pallas_src>

<mosaic_0001>
module attributes {stable_mosaic.version = 11 : i64} {
  func.func @kernel(%arg0: i32, %arg1: memref<8x1xi32, #tpu.memory_space<vmem>>, %arg2: memref<8x1xi32, #tpu.memory_space<vmem>>, %arg3: memref<1x1x8xi32, #tpu.memory_space<vmem>>, %arg4: memref<8x32xf32, #tpu.memory_space<vmem>>, %arg5: memref<8x32xf32, #tpu.memory_space<vmem>>, %arg6: memref<1x32xf32, #tpu.memory_space<vmem>>, %arg7: memref<800x128xf32, #tpu.memory_space<vmem>>, %arg8: memref<16x128xf32, #tpu.memory_space<vmem>>, %arg9: memref<8x32xf32, #tpu.memory_space<vmem>>, %arg10: memref<8x32xf32, #tpu.memory_space<vmem>>, %arg11: memref<1x32xf32, #tpu.memory_space<vmem>>, %arg12: memref<8x32xf32, #tpu.memory_space<vmem>>, %arg13: memref<8x64xf32, #tpu.memory_space<vmem>>, %arg14: memref<8x64xf32, #tpu.memory_space<vmem>>, %arg15: memref<1x32xf32, #tpu.memory_space<vmem>>, %arg16: memref<1x64xf32, #tpu.memory_space<vmem>>, %arg17: memref<8x32xf32, #tpu.memory_space<vmem>>, %arg18: memref<8x1xf32, #tpu.memory_space<vmem>>) attributes {dimension_semantics = [#tpu.dimension_semantics<arbitrary>], iteration_bounds = array<i64: 3>, scalar_prefetch = 0 : i64, scratch_operands = 7 : i64, tpu.core_type = #tpu.core_type<tc>, window_params = [{transform_indices = @transform_0, window_bounds = array<i64: 8, 1>}, {transform_indices = @transform_1, window_bounds = array<i64: 8, 1>}, {transform_indices = @transform_2, window_bounds = array<i64: 1, 1, 8>}, {transform_indices = @transform_3, window_bounds = array<i64: 8, 32>}, {pipeline_mode = #tpu.pipeline_mode<synchronous>, transform_indices = @transform_4, window_bounds = array<i64: 8, 32>}, {pipeline_mode = #tpu.pipeline_mode<synchronous>, transform_indices = @transform_5, window_bounds = array<i64: 1, 32>}, {pipeline_mode = #tpu.pipeline_mode<synchronous>, transform_indices = @transform_6, window_bounds = array<i64: 800, 128>}, {pipeline_mode = #tpu.pipeline_mode<synchronous>, transform_indices = @transform_7, window_bounds = array<i64: 16, 128>}, {transform_indices = @transform_8, window_bounds = array<i64: 8, 32>}, {pipeline_mode = #tpu.pipeline_mode<synchronous>, transform_indices = @transform_9, window_bounds = array<i64: 8, 32>}, {pipeline_mode = #tpu.pipeline_mode<synchronous>, transform_indices = @transform_10, window_bounds = array<i64: 1, 32>}]} {
    %c8_i32 = arith.constant 8 : i32
    %0 = arith.muli %arg0, %c8_i32 : i32
    %c0_i32 = arith.constant 0 : i32
    %1 = arith.cmpi eq, %arg0, %c0_i32 : i32
    %2 = arith.extui %1 : i1 to i32
    %c0_i32_0 = arith.constant 0 : i32
    %3 = arith.cmpi ne, %2, %c0_i32_0 : i32
    scf.if %3 {
      %c0_54 = arith.constant 0 : index
      %c0_55 = arith.constant 0 : index
      %112 = vector.load %arg5[%c0_54, %c0_55] : memref<8x32xf32, #tpu.memory_space<vmem>>, vector<8x32xf32>
      %c32 = arith.constant 32 : index
      %c0_56 = arith.constant 0 : index
      %113 = vector.load %arg7[%c32, %c0_56] : memref<800x128xf32, #tpu.memory_space<vmem>>, vector<32x32xf32>
      %cst_57 = arith.constant dense<0.000000e+00> : vector<8x32xf32>
      %114 = tpu.matmul %112, %113, %cst_57 {dimension_numbers = #tpu.dot_dimension_numbers<[1], [0], [0], [1], [0, 0, 1, 1], [], []>} : vector<8x32xf32>, vector<32x32xf32>, vector<8x32xf32> -> vector<8x32xf32>
      %c1 = arith.constant 1 : index
      %c0_58 = arith.constant 0 : index
      %115 = vector.load %arg8[%c1, %c0_58] : memref<16x128xf32, #tpu.memory_space<vmem>>, vector<1x32xf32>
      %116 = vector.broadcast %115 : vector<1x32xf32> to vector<8x32xf32>
      %117 = arith.addf %114, %116 : vector<8x32xf32>
      %cst_59 = arith.constant 0.000000e+00 : f32
      %118 = vector.broadcast %cst_59 : f32 to vector<8x32xf32>
      %119 = arith.maximumf %117, %118 : vector<8x32xf32>
      %120 = math.absf %117 : vector<8x32xf32>
      %cst_60 = arith.constant 0.000000e+00 : f32
      %121 = vector.broadcast %cst_60 : f32 to vector<8x32xf32>
      %122 = arith.subf %121, %120 : vector<8x32xf32>
      %123 = math.exp %122 : vector<8x32xf32>
      %cst_61 = arith.constant 1.000000e+00 : f32
      %124 = vector.broadcast %cst_61 : f32 to vector<8x32xf32>
      %125 = arith.addf %124, %123 : vector<8x32xf32>
      %126 = math.log %125 : vector<8x32xf32>
      %127 = arith.addf %119, %126 : vector<8x32xf32>
      %c0_62 = arith.constant 0 : index
      %c0_63 = arith.constant 0 : index
      %128 = vector.load %arg12[%c0_62, %c0_63] : memref<8x32xf32, #tpu.memory_space<vmem>>, vector<8x32xf32>
      tpu.vector_store %arg12[%c0_62, %c0_63], %127 {strides = array<i32>} : memref<8x32xf32, #tpu.memory_space<vmem>>, vector<8x32xf32>,
      %c96 = arith.constant 96 : index
      %c0_64 = arith.constant 0 : index
      %129 = vector.load %arg7[%c96, %c0_64] : memref<800x128xf32, #tpu.memory_space<vmem>>, vector<32x64xf32>
      %cst_65 = arith.constant dense<0.000000e+00> : vector<8x64xf32>
      %130 = tpu.matmul %127, %129, %cst_65 {dimension_numbers = #tpu.dot_dimension_numbers<[1], [0], [0], [1], [0, 0, 1, 1], [], []>} : vector<8x32xf32>, vector<32x64xf32>, vector<8x64xf32> -> vector<8x64xf32>
      %c0_66 = arith.constant 0 : index
      %c0_67 = arith.constant 0 : index
      %131 = vector.load %arg13[%c0_66, %c0_67] : memref<8x64xf32, #tpu.memory_space<vmem>>, vector<8x64xf32>
      tpu.vector_store %arg13[%c0_66, %c0_67], %130 {strides = array<i32>} : memref<8x64xf32, #tpu.memory_space<vmem>>, vector<8x64xf32>,
      %c128 = arith.constant 128 : index
      %c0_68 = arith.constant 0 : index
      %132 = vector.load %arg7[%c128, %c0_68] : memref<800x128xf32, #tpu.memory_space<vmem>>, vector<32x64xf32>
      %cst_69 = arith.constant dense<0.000000e+00> : vector<8x64xf32>
      %133 = tpu.matmul %127, %132, %cst_69 {dimension_numbers = #tpu.dot_dimension_numbers<[1], [0], [0], [1], [0, 0, 1, 1], [], []>} : vector<8x32xf32>, vector<32x64xf32>, vector<8x64xf32> -> vector<8x64xf32>
      %c0_70 = arith.constant 0 : index
      %c0_71 = arith.constant 0 : index
      %134 = vector.load %arg14[%c0_70, %c0_71] : memref<8x64xf32, #tpu.memory_space<vmem>>, vector<8x64xf32>
      tpu.vector_store %arg14[%c0_70, %c0_71], %133 {strides = array<i32>} : memref<8x64xf32, #tpu.memory_space<vmem>>, vector<8x64xf32>,
      %c0_72 = arith.constant 0 : index
      %c0_73 = arith.constant 0 : index
      %135 = vector.load %arg6[%c0_72, %c0_73] : memref<1x32xf32, #tpu.memory_space<vmem>>, vector<1x32xf32>
      %c64 = arith.constant 64 : index
      %c0_74 = arith.constant 0 : index
      %136 = vector.load %arg7[%c64, %c0_74] : memref<800x128xf32, #tpu.memory_space<vmem>>, vector<32x32xf32>
      %cst_75 = arith.constant dense<0.000000e+00> : vector<1x32xf32>
      %137 = tpu.matmul %135, %136, %cst_75 {dimension_numbers = #tpu.dot_dimension_numbers<[1], [0], [0], [1], [0, 0, 1, 1], [], []>} : vector<1x32xf32>, vector<32x32xf32>, vector<1x32xf32> -> vector<1x32xf32>
      %c2 = arith.constant 2 : index
      %c0_76 = arith.constant 0 : index
      %138 = vector.load %arg8[%c2, %c0_76] : memref<16x128xf32, #tpu.memory_space<vmem>>, vector<1x32xf32>
      %139 = arith.addf %137, %138 : vector<1x32xf32>
      %cst_77 = arith.constant 0.000000e+00 : f32
      %140 = vector.broadcast %cst_77 : f32 to vector<1x32xf32>
      %141 = arith.maximumf %139, %140 : vector<1x32xf32>
      %142 = math.absf %139 : vector<1x32xf32>
      %cst_78 = arith.constant 0.000000e+00 : f32
      %143 = vector.broadcast %cst_78 : f32 to vector<1x32xf32>
      %144 = arith.subf %143, %142 : vector<1x32xf32>
      %145 = math.exp %144 : vector<1x32xf32>
      %cst_79 = arith.constant 1.000000e+00 : f32
      %146 = vector.broadcast %cst_79 : f32 to vector<1x32xf32>
      %147 = arith.addf %146, %145 : vector<1x32xf32>
      %148 = math.log %147 : vector<1x32xf32>
      %149 = arith.addf %141, %148 : vector<1x32xf32>
      %c0_80 = arith.constant 0 : index
      %c0_81 = arith.constant 0 : index
      %150 = vector.load %arg15[%c0_80, %c0_81] : memref<1x32xf32, #tpu.memory_space<vmem>>, vector<1x32xf32>
      tpu.vector_store %arg15[%c0_80, %c0_81], %149 {strides = array<i32>} : memref<1x32xf32, #tpu.memory_space<vmem>>, vector<1x32xf32>,
      %c192 = arith.constant 192 : index
      %c0_82 = arith.constant 0 : index
      %151 = vector.load %arg7[%c192, %c0_82] : memref<800x128xf32, #tpu.memory_space<vmem>>, vector<32x64xf32>
      %cst_83 = arith.constant dense<0.000000e+00> : vector<1x64xf32>
      %152 = tpu.matmul %149, %151, %cst_83 {dimension_numbers = #tpu.dot_dimension_numbers<[1], [0], [0], [1], [0, 0, 1, 1], [], []>} : vector<1x32xf32>, vector<32x64xf32>, vector<1x64xf32> -> vector<1x64xf32>
      %c3 = arith.constant 3 : index
      %c0_84 = arith.constant 0 : index
      %153 = vector.load %arg8[%c3, %c0_84] : memref<16x128xf32, #tpu.memory_space<vmem>>, vector<1x64xf32>
      %154 = arith.addf %152, %153 : vector<1x64xf32>
      %c0_85 = arith.constant 0 : index
      %c0_86 = arith.constant 0 : index
      %155 = vector.load %arg16[%c0_85, %c0_86] : memref<1x64xf32, #tpu.memory_space<vmem>>, vector<1x64xf32>
      tpu.vector_store %arg16[%c0_85, %c0_86], %154 {strides = array<i32>} : memref<1x64xf32, #tpu.memory_space<vmem>>, vector<1x64xf32>,
      %cst_87 = arith.constant 0.000000e+00 : f32
      %156 = vector.broadcast %cst_87 : f32 to vector<8x32xf32>
      %c0_88 = arith.constant 0 : index
      %c0_89 = arith.constant 0 : index
      %157 = vector.load %arg17[%c0_88, %c0_89] : memref<8x32xf32, #tpu.memory_space<vmem>>, vector<8x32xf32>
      tpu.vector_store %arg17[%c0_88, %c0_89], %156 {strides = array<i32>} : memref<8x32xf32, #tpu.memory_space<vmem>>, vector<8x32xf32>,
      %cst_90 = arith.constant 0.000000e+00 : f32
      %158 = vector.broadcast %cst_90 : f32 to vector<8x1xf32>
      %c0_91 = arith.constant 0 : index
      %c0_92 = arith.constant 0 : index
      %159 = vector.load %arg18[%c0_91, %c0_92] : memref<8x1xf32, #tpu.memory_space<vmem>>, vector<8x1xf32>
      tpu.vector_store %arg18[%c0_91, %c0_92], %158 {strides = array<i32>} : memref<8x1xf32, #tpu.memory_space<vmem>>, vector<8x1xf32>,
    } else {
    }
    %c0 = arith.constant 0 : index
    %c0_1 = arith.constant 0 : index
    %4 = vector.load %arg1[%c0, %c0_1] : memref<8x1xi32, #tpu.memory_space<vmem>>, vector<8x1xi32>
    %c0_2 = arith.constant 0 : index
    %c0_3 = arith.constant 0 : index
    %5 = vector.load %arg2[%c0_2, %c0_3] : memref<8x1xi32, #tpu.memory_space<vmem>>, vector<8x1xi32>
    %6 = tpu.iota {dimensions = array<i32: 1>} : vector<8x8xi32>
    %7 = vector.broadcast %4 : vector<8x1xi32> to vector<8x8xi32>
    %8 = arith.cmpi eq, %6, %7 : vector<8x8xi32>
    %9 = arith.extui %8 : vector<8x8xi1> to vector<8x8xi32>
    %10 = arith.sitofp %9 : vector<8x8xi32> to vector<8x8xf32>
    %11 = vector.broadcast %5 : vector<8x1xi32> to vector<8x8xi32>
    %12 = arith.cmpi eq, %6, %11 : vector<8x8xi32>
    %13 = arith.extui %12 : vector<8x8xi1> to vector<8x8xi32>
    %14 = arith.sitofp %13 : vector<8x8xi32> to vector<8x8xf32>
    %c0_4 = arith.constant 0 : index
    %c0_5 = arith.constant 0 : index
    %15 = vector.load %arg4[%c0_4, %c0_5] : memref<8x32xf32, #tpu.memory_space<vmem>>, vector<8x32xf32>
    %c0_6 = arith.constant 0 : index
    %c0_7 = arith.constant 0 : index
    %16 = vector.load %arg7[%c0_6, %c0_7] : memref<800x128xf32, #tpu.memory_space<vmem>>, vector<32x32xf32>
    %cst = arith.constant dense<0.000000e+00> : vector<8x32xf32>
    %17 = tpu.matmul %15, %16, %cst {dimension_numbers = #tpu.dot_dimension_numbers<[1], [0], [0], [1], [0, 0, 1, 1], [], []>} : vector<8x32xf32>, vector<32x32xf32>, vector<8x32xf32> -> vector<8x32xf32>
    %c0_8 = arith.constant 0 : index
    %c0_9 = arith.constant 0 : index
    %18 = vector.load %arg8[%c0_8, %c0_9] : memref<16x128xf32, #tpu.memory_space<vmem>>, vector<1x32xf32>
    %19 = vector.broadcast %18 : vector<1x32xf32> to vector<8x32xf32>
    %20 = arith.addf %17, %19 : vector<8x32xf32>
    %cst_10 = arith.constant 0.000000e+00 : f32
    %21 = vector.broadcast %cst_10 : f32 to vector<8x32xf32>
    %22 = arith.maximumf %20, %21 : vector<8x32xf32>
    %23 = math.absf %20 : vector<8x32xf32>
    %cst_11 = arith.constant 0.000000e+00 : f32
    %24 = vector.broadcast %cst_11 : f32 to vector<8x32xf32>
    %25 = arith.subf %24, %23 : vector<8x32xf32>
    %26 = math.exp %25 : vector<8x32xf32>
    %cst_12 = arith.constant 1.000000e+00 : f32
    %27 = vector.broadcast %cst_12 : f32 to vector<8x32xf32>
    %28 = arith.addf %27, %26 : vector<8x32xf32>
    %29 = math.log %28 : vector<8x32xf32>
    %30 = arith.addf %22, %29 : vector<8x32xf32>
    %c0_13 = arith.constant 0 : index
    %c0_14 = arith.constant 0 : index
    %31 = vector.load %arg13[%c0_13, %c0_14] : memref<8x64xf32, #tpu.memory_space<vmem>>, vector<8x64xf32>
    %cst_15 = arith.constant dense<0.000000e+00> : vector<8x64xf32>
    %32 = tpu.matmul %10, %31, %cst_15 {dimension_numbers = #tpu.dot_dimension_numbers<[1], [0], [0], [1], [0, 0, 1, 1], [], []>} : vector<8x8xf32>, vector<8x64xf32>, vector<8x64xf32> -> vector<8x64xf32>
    %c0_16 = arith.constant 0 : index
    %c0_17 = arith.constant 0 : index
    %33 = vector.load %arg14[%c0_16, %c0_17] : memref<8x64xf32, #tpu.memory_space<vmem>>, vector<8x64xf32>
    %cst_18 = arith.constant dense<0.000000e+00> : vector<8x64xf32>
    %34 = tpu.matmul %14, %33, %cst_18 {dimension_numbers = #tpu.dot_dimension_numbers<[1], [0], [0], [1], [0, 0, 1, 1], [], []>} : vector<8x8xf32>, vector<8x64xf32>, vector<8x64xf32> -> vector<8x64xf32>
    %35 = arith.addf %32, %34 : vector<8x64xf32>
    %c160 = arith.constant 160 : index
    %c0_19 = arith.constant 0 : index
    %36 = vector.load %arg7[%c160, %c0_19] : memref<800x128xf32, #tpu.memory_space<vmem>>, vector<32x64xf32>
    %cst_20 = arith.constant dense<0.000000e+00> : vector<8x64xf32>
    %37 = tpu.matmul %30, %36, %cst_20 {dimension_numbers = #tpu.dot_dimension_numbers<[1], [0], [0], [1], [0, 0, 1, 1], [], []>} : vector<8x32xf32>, vector<32x64xf32>, vector<8x64xf32> -> vector<8x64xf32>
    %38 = arith.addf %35, %37 : vector<8x64xf32>
    %c0_21 = arith.constant 0 : index
    %c0_22 = arith.constant 0 : index
    %39 = vector.load %arg16[%c0_21, %c0_22] : memref<1x64xf32, #tpu.memory_space<vmem>>, vector<1x64xf32>
    %40 = vector.broadcast %39 : vector<1x64xf32> to vector<8x64xf32>
    %41 = arith.addf %38, %40 : vector<8x64xf32>
    %cst_23 = arith.constant 0.000000e+00 : f32
    %42 = vector.broadcast %cst_23 : f32 to vector<8x64xf32>
    %43 = arith.maximumf %41, %42 : vector<8x64xf32>
    %44 = math.absf %41 : vector<8x64xf32>
    %cst_24 = arith.constant 0.000000e+00 : f32
    %45 = vector.broadcast %cst_24 : f32 to vector<8x64xf32>
    %46 = arith.subf %45, %44 : vector<8x64xf32>
    %47 = math.exp %46 : vector<8x64xf32>
    %cst_25 = arith.constant 1.000000e+00 : f32
    %48 = vector.broadcast %cst_25 : f32 to vector<8x64xf32>
    %49 = arith.addf %48, %47 : vector<8x64xf32>
    %50 = math.log %49 : vector<8x64xf32>
    %51 = arith.addf %43, %50 : vector<8x64xf32>
    %c224 = arith.constant 224 : index
    %c0_26 = arith.constant 0 : index
    %52 = vector.load %arg7[%c224, %c0_26] : memref<800x128xf32, #tpu.memory_space<vmem>>, vector<64x64xf32>
    %cst_27 = arith.constant dense<0.000000e+00> : vector<8x64xf32>
    %53 = tpu.matmul %51, %52, %cst_27 {dimension_numbers = #tpu.dot_dimension_numbers<[1], [0], [0], [1], [0, 0, 1, 1], [], []>} : vector<8x64xf32>, vector<64x64xf32>, vector<8x64xf32> -> vector<8x64xf32>
    %c4 = arith.constant 4 : index
    %c0_28 = arith.constant 0 : index
    %54 = vector.load %arg8[%c4, %c0_28] : memref<16x128xf32, #tpu.memory_space<vmem>>, vector<1x64xf32>
    %55 = vector.broadcast %54 : vector<1x64xf32> to vector<8x64xf32>
    %56 = arith.addf %53, %55 : vector<8x64xf32>
    %cst_29 = arith.constant 0.000000e+00 : f32
    %57 = vector.broadcast %cst_29 : f32 to vector<8x64xf32>
    %58 = arith.maximumf %56, %57 : vector<8x64xf32>
    %59 = math.absf %56 : vector<8x64xf32>
    %cst_30 = arith.constant 0.000000e+00 : f32
    %60 = vector.broadcast %cst_30 : f32 to vector<8x64xf32>
    %61 = arith.subf %60, %59 : vector<8x64xf32>
    %62 = math.exp %61 : vector<8x64xf32>
    %cst_31 = arith.constant 1.000000e+00 : f32
    %63 = vector.broadcast %cst_31 : f32 to vector<8x64xf32>
    %64 = arith.addf %63, %62 : vector<8x64xf32>
    %65 = math.log %64 : vector<8x64xf32>
    %66 = arith.addf %58, %65 : vector<8x64xf32>
    %c288 = arith.constant 288 : index
    %c0_32 = arith.constant 0 : index
    %67 = vector.load %arg7[%c288, %c0_32] : memref<800x128xf32, #tpu.memory_space<vmem>>, vector<64x32xf32>
    %cst_33 = arith.constant dense<0.000000e+00> : vector<8x32xf32>
    %68 = tpu.matmul %66, %67, %cst_33 {dimension_numbers = #tpu.dot_dimension_numbers<[1], [0], [0], [1], [0, 0, 1, 1], [], []>} : vector<8x64xf32>, vector<64x32xf32>, vector<8x32xf32> -> vector<8x32xf32>
    %c5 = arith.constant 5 : index
    %c0_34 = arith.constant 0 : index
    %69 = vector.load %arg8[%c5, %c0_34] : memref<16x128xf32, #tpu.memory_space<vmem>>, vector<1x32xf32>
    %70 = vector.broadcast %69 : vector<1x32xf32> to vector<8x32xf32>
    %71 = arith.addf %68, %70 : vector<8x32xf32>
    %cst_35 = arith.constant 0.000000e+00 : f32
    %72 = vector.broadcast %cst_35 : f32 to vector<8x32xf32>
    %73 = arith.maximumf %71, %72 : vector<8x32xf32>
    %74 = math.absf %71 : vector<8x32xf32>
    %cst_36 = arith.constant 0.000000e+00 : f32
    %75 = vector.broadcast %cst_36 : f32 to vector<8x32xf32>
    %76 = arith.subf %75, %74 : vector<8x32xf32>
    %77 = math.exp %76 : vector<8x32xf32>
    %cst_37 = arith.constant 1.000000e+00 : f32
    %78 = vector.broadcast %cst_37 : f32 to vector<8x32xf32>
    %79 = arith.addf %78, %77 : vector<8x32xf32>
    %80 = math.log %79 : vector<8x32xf32>
    %81 = arith.addf %73, %80 : vector<8x32xf32>
    %82 = arith.addf %81, %15 : vector<8x32xf32>
    %c0_38 = arith.constant 0 : index
    %c0_39 = arith.constant 0 : index
    %83 = vector.load %arg9[%c0_38, %c0_39] : memref<8x32xf32, #tpu.memory_space<vmem>>, vector<8x32xf32>
    tpu.vector_store %arg9[%c0_38, %c0_39], %82 {strides = array<i32>} : memref<8x32xf32, #tpu.memory_space<vmem>>, vector<8x32xf32>,
    %c0_40 = arith.constant 0 : index
    %c0_41 = arith.constant 0 : index
    %c0_42 = arith.constant 0 : index
    %84 = vector.load %arg3[%c0_40, %c0_41, %c0_42] : memref<1x1x8xi32, #tpu.memory_space<vmem>>, vector<1x1x8xi32>
    %85 = vector.shape_cast %84 : vector<1x1x8xi32> to vector<1x8xi32>
    %86 = tpu.iota {dimensions = array<i32: 0>} : vector<8x8xi32>
    %87 = tpu.iota {dimensions = array<i32: 1>} : vector<1x8xi32>
    %88 = vector.broadcast %0 : i32 to vector<1x8xi32>
    %89 = arith.addi %87, %88 : vector<1x8xi32>
    %c20_i32 = arith.constant 20 : i32
    %90 = vector.broadcast %c20_i32 : i32 to vector<1x8xi32>
    %91 = arith.cmpi slt, %89, %90 : vector<1x8xi32>
    %92 = arith.extui %91 : vector<1x8xi1> to vector<1x8xi32>
    %93 = arith.sitofp %92 : vector<1x8xi32> to vector<1x8xf32>
    %94 = vector.broadcast %85 : vector<1x8xi32> to vector<8x8xi32>
    %95 = arith.cmpi eq, %86, %94 : vector<8x8xi32>
    %96 = arith.extui %95 : vector<8x8xi1> to vector<8x8xi32>
    %97 = arith.sitofp %96 : vector<8x8xi32> to vector<8x8xf32>
    %98 = vector.broadcast %93 : vector<1x8xf32> to vector<8x8xf32>
    %99 = arith.mulf %97, %98 : vector<8x8xf32>
    %c0_43 = arith.constant 0 : index
    %c0_44 = arith.constant 0 : index
    %100 = vector.load %arg17[%c0_43, %c0_44] : memref<8x32xf32, #tpu.memory_space<vmem>>, vector<8x32xf32>
    %cst_45 = arith.constant dense<0.000000e+00> : vector<8x32xf32>
    %101 = tpu.matmul %99, %81, %cst_45 {dimension_numbers = #tpu.dot_dimension_numbers<[1], [0], [0], [1], [0, 0, 1, 1], [], []>} : vector<8x8xf32>, vector<8x32xf32>, vector<8x32xf32> -> vector<8x32xf32>
    %102 = arith.addf %100, %101 : vector<8x32xf32>
    %c0_46 = arith.constant 0 : index
    %c0_47 = arith.constant 0 : index
    %103 = vector.load %arg17[%c0_46, %c0_47] : memref<8x32xf32, #tpu.memory_space<vmem>>, vector<8x32xf32>
    tpu.vector_store %arg17[%c0_46, %c0_47], %102 {strides = array<i32>} : memref<8x32xf32, #tpu.memory_space<vmem>>, vector<8x32xf32>,
    %c0_48 = arith.constant 0 : index
    %c0_49 = arith.constant 0 : index
    %104 = vector.load %arg18[%c0_48, %c0_49] : memref<8x1xf32, #tpu.memory_space<vmem>>, vector<8x1xf32>
    %cst_50 = arith.constant dense<0.000000e+00> : vector<8xf32>
    %105 = vector.multi_reduction <add>, %99, %cst_50 [1] : vector<8x8xf32> to vector<8xf32>
    %106 = vector.shape_cast %105 : vector<8xf32> to vector<8x1xf32>
    %107 = arith.addf %104, %106 : vector<8x1xf32>
    %c0_51 = arith.constant 0 : index
    %c0_52 = arith.constant 0 : index
    %108 = vector.load %arg18[%c0_51, %c0_52] : memref<8x1xf32, #tpu.memory_space<vmem>>, vector<8x1xf32>
    tpu.vector_store %arg18[%c0_51, %c0_52], %107 {strides = array<i32>} : memref<8x1xf32, #tpu.memory_space<vmem>>, vector<8x1xf32>,
    %c2_i32 = arith.constant 2 : i32
    %109 = arith.cmpi eq, %arg0, %c2_i32 : i32
    %110 = arith.extui %109 : i1 to i32
    %c0_i32_53 = arith.constant 0 : i32
    %111 = arith.cmpi ne, %110, %c0_i32_53 : i32
    scf.if %111 {
      %c0_54 = arith.constant 0 : index
      %c0_55 = arith.constant 0 : index
      %112 = vector.load %arg18[%c0_54, %c0_55] : memref<8x1xf32, #tpu.memory_space<vmem>>, vector<8x1xf32>
      %cst_56 = arith.constant 1.000000e+00 : f32
      %113 = vector.broadcast %cst_56 : f32 to vector<8x1xf32>
      %114 = arith.maximumf %112, %113 : vector<8x1xf32>
      %c0_57 = arith.constant 0 : index
      %c0_58 = arith.constant 0 : index
      %115 = vector.load %arg17[%c0_57, %c0_58] : memref<8x32xf32, #tpu.memory_space<vmem>>, vector<8x32xf32>
      %116 = vector.broadcast %114 : vector<8x1xf32> to vector<8x32xf32>
      %117 = arith.divf %115, %116 : vector<8x32xf32>
      %c0_59 = arith.constant 0 : index
      %c0_60 = arith.constant 0 : index
      %118 = vector.load %arg12[%c0_59, %c0_60] : memref<8x32xf32, #tpu.memory_space<vmem>>, vector<8x32xf32>
      %c0_61 = arith.constant 0 : index
      %c0_62 = arith.constant 0 : index
      %119 = vector.load %arg15[%c0_61, %c0_62] : memref<1x32xf32, #tpu.memory_space<vmem>>, vector<1x32xf32>
      %c352 = arith.constant 352 : index
      %c0_63 = arith.constant 0 : index
      %120 = vector.load %arg7[%c352, %c0_63] : memref<800x128xf32, #tpu.memory_space<vmem>>, vector<32x64xf32>
      %cst_64 = arith.constant dense<0.000000e+00> : vector<8x64xf32>
      %121 = tpu.matmul %118, %120, %cst_64 {dimension_numbers = #tpu.dot_dimension_numbers<[1], [0], [0], [1], [0, 0, 1, 1], [], []>} : vector<8x32xf32>, vector<32x64xf32>, vector<8x64xf32> -> vector<8x64xf32>
      %c384 = arith.constant 384 : index
      %c0_65 = arith.constant 0 : index
      %122 = vector.load %arg7[%c384, %c0_65] : memref<800x128xf32, #tpu.memory_space<vmem>>, vector<32x64xf32>
      %cst_66 = arith.constant dense<0.000000e+00> : vector<8x64xf32>
      %123 = tpu.matmul %117, %122, %cst_66 {dimension_numbers = #tpu.dot_dimension_numbers<[1], [0], [0], [1], [0, 0, 1, 1], [], []>} : vector<8x32xf32>, vector<32x64xf32>, vector<8x64xf32> -> vector<8x64xf32>
      %124 = arith.addf %121, %123 : vector<8x64xf32>
      %c416 = arith.constant 416 : index
      %c0_67 = arith.constant 0 : index
      %125 = vector.load %arg7[%c416, %c0_67] : memref<800x128xf32, #tpu.memory_space<vmem>>, vector<32x64xf32>
      %cst_68 = arith.constant dense<0.000000e+00> : vector<1x64xf32>
      %126 = tpu.matmul %119, %125, %cst_68 {dimension_numbers = #tpu.dot_dimension_numbers<[1], [0], [0], [1], [0, 0, 1, 1], [], []>} : vector<1x32xf32>, vector<32x64xf32>, vector<1x64xf32> -> vector<1x64xf32>
      %127 = vector.broadcast %126 : vector<1x64xf32> to vector<8x64xf32>
      %128 = arith.addf %124, %127 : vector<8x64xf32>
      %c6 = arith.constant 6 : index
      %c0_69 = arith.constant 0 : index
      %129 = vector.load %arg8[%c6, %c0_69] : memref<16x128xf32, #tpu.memory_space<vmem>>, vector<1x64xf32>
      %130 = vector.broadcast %129 : vector<1x64xf32> to vector<8x64xf32>
      %131 = arith.addf %128, %130 : vector<8x64xf32>
      %cst_70 = arith.constant 0.000000e+00 : f32
      %132 = vector.broadcast %cst_70 : f32 to vector<8x64xf32>
      %133 = arith.maximumf %131, %132 : vector<8x64xf32>
      %134 = math.absf %131 : vector<8x64xf32>
      %cst_71 = arith.constant 0.000000e+00 : f32
      %135 = vector.broadcast %cst_71 : f32 to vector<8x64xf32>
      %136 = arith.subf %135, %134 : vector<8x64xf32>
      %137 = math.exp %136 : vector<8x64xf32>
      %cst_72 = arith.constant 1.000000e+00 : f32
      %138 = vector.broadcast %cst_72 : f32 to vector<8x64xf32>
      %139 = arith.addf %138, %137 : vector<8x64xf32>
      %140 = math.log %139 : vector<8x64xf32>
      %141 = arith.addf %133, %140 : vector<8x64xf32>
      %c448 = arith.constant 448 : index
      %c0_73 = arith.constant 0 : index
      %142 = vector.load %arg7[%c448, %c0_73] : memref<800x128xf32, #tpu.memory_space<vmem>>, vector<64x64xf32>
      %cst_74 = arith.constant dense<0.000000e+00> : vector<8x64xf32>
      %143 = tpu.matmul %141, %142, %cst_74 {dimension_numbers = #tpu.dot_dimension_numbers<[1], [0], [0], [1], [0, 0, 1, 1], [], []>} : vector<8x64xf32>, vector<64x64xf32>, vector<8x64xf32> -> vector<8x64xf32>
      %c7 = arith.constant 7 : index
      %c0_75 = arith.constant 0 : index
      %144 = vector.load %arg8[%c7, %c0_75] : memref<16x128xf32, #tpu.memory_space<vmem>>, vector<1x64xf32>
      %145 = vector.broadcast %144 : vector<1x64xf32> to vector<8x64xf32>
      %146 = arith.addf %143, %145 : vector<8x64xf32>
      %cst_76 = arith.constant 0.000000e+00 : f32
      %147 = vector.broadcast %cst_76 : f32 to vector<8x64xf32>
      %148 = arith.maximumf %146, %147 : vector<8x64xf32>
      %149 = math.absf %146 : vector<8x64xf32>
      %cst_77 = arith.constant 0.000000e+00 : f32
      %150 = vector.broadcast %cst_77 : f32 to vector<8x64xf32>
      %151 = arith.subf %150, %149 : vector<8x64xf32>
      %152 = math.exp %151 : vector<8x64xf32>
      %cst_78 = arith.constant 1.000000e+00 : f32
      %153 = vector.broadcast %cst_78 : f32 to vector<8x64xf32>
      %154 = arith.addf %153, %152 : vector<8x64xf32>
      %155 = math.log %154 : vector<8x64xf32>
      %156 = arith.addf %148, %155 : vector<8x64xf32>
      %c512 = arith.constant 512 : index
      %c0_79 = arith.constant 0 : index
      %157 = vector.load %arg7[%c512, %c0_79] : memref<800x128xf32, #tpu.memory_space<vmem>>, vector<64x32xf32>
      %cst_80 = arith.constant dense<0.000000e+00> : vector<8x32xf32>
      %158 = tpu.matmul %156, %157, %cst_80 {dimension_numbers = #tpu.dot_dimension_numbers<[1], [0], [0], [1], [0, 0, 1, 1], [], []>} : vector<8x64xf32>, vector<64x32xf32>, vector<8x32xf32> -> vector<8x32xf32>
      %c8 = arith.constant 8 : index
      %c0_81 = arith.constant 0 : index
      %159 = vector.load %arg8[%c8, %c0_81] : memref<16x128xf32, #tpu.memory_space<vmem>>, vector<1x32xf32>
      %160 = vector.broadcast %159 : vector<1x32xf32> to vector<8x32xf32>
      %161 = arith.addf %158, %160 : vector<8x32xf32>
      %cst_82 = arith.constant 0.000000e+00 : f32
      %162 = vector.broadcast %cst_82 : f32 to vector<8x32xf32>
      %163 = arith.maximumf %161, %162 : vector<8x32xf32>
      %164 = math.absf %161 : vector<8x32xf32>
      %cst_83 = arith.constant 0.000000e+00 : f32
      %165 = vector.broadcast %cst_83 : f32 to vector<8x32xf32>
      %166 = arith.subf %165, %164 : vector<8x32xf32>
      %167 = math.exp %166 : vector<8x32xf32>
      %cst_84 = arith.constant 1.000000e+00 : f32
      %168 = vector.broadcast %cst_84 : f32 to vector<8x32xf32>
      %169 = arith.addf %168, %167 : vector<8x32xf32>
      %170 = math.log %169 : vector<8x32xf32>
      %171 = arith.addf %163, %170 : vector<8x32xf32>
      %c0_85 = arith.constant 0 : index
      %c0_86 = arith.constant 0 : index
      %172 = vector.load %arg5[%c0_85, %c0_86] : memref<8x32xf32, #tpu.memory_space<vmem>>, vector<8x32xf32>
      %173 = arith.addf %171, %172 : vector<8x32xf32>
      %c0_87 = arith.constant 0 : index
      %c0_88 = arith.constant 0 : index
      %174 = vector.load %arg10[%c0_87, %c0_88] : memref<8x32xf32, #tpu.memory_space<vmem>>, vector<8x32xf32>
      tpu.vector_store %arg10[%c0_87, %c0_88], %173 {strides = array<i32>} : memref<8x32xf32, #tpu.memory_space<vmem>>, vector<8x32xf32>,
      %175 = tpu.iota {dimensions = array<i32: 0>} : vector<8x1xi32>
      %c8_i32_89 = arith.constant 8 : i32
      %176 = vector.broadcast %c8_i32_89 : i32 to vector<8x1xi32>
      %177 = arith.cmpi slt, %175, %176 : vector<8x1xi32>
      %178 = arith.extui %177 : vector<8x1xi1> to vector<8x1xi32>
      %179 = arith.sitofp %178 : vector<8x1xi32> to vector<8x1xf32>
      %c0_90 = arith.constant 0 : index
      %c0_91 = arith.constant 0 : index
      %180 = vector.load %arg17[%c0_90, %c0_91] : memref<8x32xf32, #tpu.memory_space<vmem>>, vector<8x32xf32>
      %cst_92 = arith.constant dense<0.000000e+00> : vector<32xf32>
      %181 = vector.multi_reduction <add>, %180, %cst_92 [0] : vector<8x32xf32> to vector<32xf32>
      %182 = vector.shape_cast %181 : vector<32xf32> to vector<1x32xf32>
      %cst_93 = arith.constant 5.000000e-02 : f32
      %183 = vector.broadcast %cst_93 : f32 to vector<1x32xf32>
      %184 = arith.mulf %182, %183 : vector<1x32xf32>
      %185 = vector.broadcast %179 : vector<8x1xf32> to vector<8x32xf32>
      %186 = arith.mulf %171, %185 : vector<8x32xf32>
      %cst_94 = arith.constant dense<0.000000e+00> : vector<32xf32>
      %187 = vector.multi_reduction <add>, %186, %cst_94 [0] : vector<8x32xf32> to vector<32xf32>
      %188 = vector.shape_cast %187 : vector<32xf32> to vector<1x32xf32>
      %cst_95 = arith.constant 1.250000e-01 : f32
      %189 = vector.broadcast %cst_95 : f32 to vector<1x32xf32>
      %190 = arith.mulf %188, %189 : vector<1x32xf32>
      %c576 = arith.constant 576 : index
      %c0_96 = arith.constant 0 : index
      %191 = vector.load %arg7[%c576, %c0_96] : memref<800x128xf32, #tpu.memory_space<vmem>>, vector<32x64xf32>
      %cst_97 = arith.constant dense<0.000000e+00> : vector<1x64xf32>
      %192 = tpu.matmul %119, %191, %cst_97 {dimension_numbers = #tpu.dot_dimension_numbers<[1], [0], [0], [1], [0, 0, 1, 1], [], []>} : vector<1x32xf32>, vector<32x64xf32>, vector<1x64xf32> -> vector<1x64xf32>
      %c608 = arith.constant 608 : index
      %c0_98 = arith.constant 0 : index
      %193 = vector.load %arg7[%c608, %c0_98] : memref<800x128xf32, #tpu.memory_space<vmem>>, vector<32x64xf32>
      %cst_99 = arith.constant dense<0.000000e+00> : vector<1x64xf32>
      %194 = tpu.matmul %184, %193, %cst_99 {dimension_numbers = #tpu.dot_dimension_numbers<[1], [0], [0], [1], [0, 0, 1, 1], [], []>} : vector<1x32xf32>, vector<32x64xf32>, vector<1x64xf32> -> vector<1x64xf32>
      %195 = arith.addf %192, %194 : vector<1x64xf32>
      %c640 = arith.constant 640 : index
      %c0_100 = arith.constant 0 : index
      %196 = vector.load %arg7[%c640, %c0_100] : memref<800x128xf32, #tpu.memory_space<vmem>>, vector<32x64xf32>
      %cst_101 = arith.constant dense<0.000000e+00> : vector<1x64xf32>
      %197 = tpu.matmul %190, %196, %cst_101 {dimension_numbers = #tpu.dot_dimension_numbers<[1], [0], [0], [1], [0, 0, 1, 1], [], []>} : vector<1x32xf32>, vector<32x64xf32>, vector<1x64xf32> -> vector<1x64xf32>
      %198 = arith.addf %195, %197 : vector<1x64xf32>
      %c9 = arith.constant 9 : index
      %c0_102 = arith.constant 0 : index
      %199 = vector.load %arg8[%c9, %c0_102] : memref<16x128xf32, #tpu.memory_space<vmem>>, vector<1x64xf32>
      %200 = arith.addf %198, %199 : vector<1x64xf32>
      %cst_103 = arith.constant 0.000000e+00 : f32
      %201 = vector.broadcast %cst_103 : f32 to vector<1x64xf32>
      %202 = arith.maximumf %200, %201 : vector<1x64xf32>
      %203 = math.absf %200 : vector<1x64xf32>
      %cst_104 = arith.constant 0.000000e+00 : f32
      %204 = vector.broadcast %cst_104 : f32 to vector<1x64xf32>
      %205 = arith.subf %204, %203 : vector<1x64xf32>
      %206 = math.exp %205 : vector<1x64xf32>
      %cst_105 = arith.constant 1.000000e+00 : f32
      %207 = vector.broadcast %cst_105 : f32 to vector<1x64xf32>
      %208 = arith.addf %207, %206 : vector<1x64xf32>
      %209 = math.log %208 : vector<1x64xf32>
      %210 = arith.addf %202, %209 : vector<1x64xf32>
      %c672 = arith.constant 672 : index
      %c0_106 = arith.constant 0 : index
      %211 = vector.load %arg7[%c672, %c0_106] : memref<800x128xf32, #tpu.memory_space<vmem>>, vector<64x64xf32>
      %cst_107 = arith.constant dense<0.000000e+00> : vector<1x64xf32>
      %212 = tpu.matmul %210, %211, %cst_107 {dimension_numbers = #tpu.dot_dimension_numbers<[1], [0], [0], [1], [0, 0, 1, 1], [], []>} : vector<1x64xf32>, vector<64x64xf32>, vector<1x64xf32> -> vector<1x64xf32>
      %c10 = arith.constant 10 : index
      %c0_108 = arith.constant 0 : index
      %213 = vector.load %arg8[%c10, %c0_108] : memref<16x128xf32, #tpu.memory_space<vmem>>, vector<1x64xf32>
      %214 = arith.addf %212, %213 : vector<1x64xf32>
      %cst_109 = arith.constant 0.000000e+00 : f32
      %215 = vector.broadcast %cst_109 : f32 to vector<1x64xf32>
      %216 = arith.maximumf %214, %215 : vector<1x64xf32>
      %217 = math.absf %214 : vector<1x64xf32>
      %cst_110 = arith.constant 0.000000e+00 : f32
      %218 = vector.broadcast %cst_110 : f32 to vector<1x64xf32>
      %219 = arith.subf %218, %217 : vector<1x64xf32>
      %220 = math.exp %219 : vector<1x64xf32>
      %cst_111 = arith.constant 1.000000e+00 : f32
      %221 = vector.broadcast %cst_111 : f32 to vector<1x64xf32>
      %222 = arith.addf %221, %220 : vector<1x64xf32>
      %223 = math.log %222 : vector<1x64xf32>
      %224 = arith.addf %216, %223 : vector<1x64xf32>
      %c736 = arith.constant 736 : index
      %c0_112 = arith.constant 0 : index
      %225 = vector.load %arg7[%c736, %c0_112] : memref<800x128xf32, #tpu.memory_space<vmem>>, vector<64x32xf32>
      %cst_113 = arith.constant dense<0.000000e+00> : vector<1x32xf32>
      %226 = tpu.matmul %224, %225, %cst_113 {dimension_numbers = #tpu.dot_dimension_numbers<[1], [0], [0], [1], [0, 0, 1, 1], [], []>} : vector<1x64xf32>, vector<64x32xf32>, vector<1x32xf32> -> vector<1x32xf32>
      %c11 = arith.constant 11 : index
      %c0_114 = arith.constant 0 : index
      %227 = vector.load %arg8[%c11, %c0_114] : memref<16x128xf32, #tpu.memory_space<vmem>>, vector<1x32xf32>
      %228 = arith.addf %226, %227 : vector<1x32xf32>
      %cst_115 = arith.constant 0.000000e+00 : f32
      %229 = vector.broadcast %cst_115 : f32 to vector<1x32xf32>
      %230 = arith.maximumf %228, %229 : vector<1x32xf32>
      %231 = math.absf %228 : vector<1x32xf32>
      %cst_116 = arith.constant 0.000000e+00 : f32
      %232 = vector.broadcast %cst_116 : f32 to vector<1x32xf32>
      %233 = arith.subf %232, %231 : vector<1x32xf32>
      %234 = math.exp %233 : vector<1x32xf32>
      %cst_117 = arith.constant 1.000000e+00 : f32
      %235 = vector.broadcast %cst_117 : f32 to vector<1x32xf32>
      %236 = arith.addf %235, %234 : vector<1x32xf32>
      %237 = math.log %236 : vector<1x32xf32>
      %238 = arith.addf %230, %237 : vector<1x32xf32>
      %c0_118 = arith.constant 0 : index
      %c0_119 = arith.constant 0 : index
      %239 = vector.load %arg6[%c0_118, %c0_119] : memref<1x32xf32, #tpu.memory_space<vmem>>, vector<1x32xf32>
      %240 = arith.addf %238, %239 : vector<1x32xf32>
      %c0_120 = arith.constant 0 : index
      %c0_121 = arith.constant 0 : index
      %241 = vector.load %arg11[%c0_120, %c0_121] : memref<1x32xf32, #tpu.memory_space<vmem>>, vector<1x32xf32>
      tpu.vector_store %arg11[%c0_120, %c0_121], %240 {strides = array<i32>} : memref<1x32xf32, #tpu.memory_space<vmem>>, vector<1x32xf32>,
    } else {
    }
    return
  }
  func.func @transform_0(%arg0: i32) -> (i32, i32) {
    %c0_i32 = arith.constant 0 : i32
    %c0_i32_0 = arith.constant 0 : i32
    return %arg0, %c0_i32 : i32, i32
  }
  func.func @transform_1(%arg0: i32) -> (i32, i32) {
    %c0_i32 = arith.constant 0 : i32
    %c0_i32_0 = arith.constant 0 : i32
    return %arg0, %c0_i32 : i32, i32
  }
  func.func @transform_2(%arg0: i32) -> (i32, i32, i32) {
    %c0_i32 = arith.constant 0 : i32
    %c0_i32_0 = arith.constant 0 : i32
    %c0_i32_1 = arith.constant 0 : i32
    return %arg0, %c0_i32, %c0_i32_0 : i32, i32, i32
  }
  func.func @transform_3(%arg0: i32) -> (i32, i32) {
    %c0_i32 = arith.constant 0 : i32
    %c0_i32_0 = arith.constant 0 : i32
    return %arg0, %c0_i32 : i32, i32
  }
  func.func @transform_4(%arg0: i32) -> (i32, i32) {
    %c0_i32 = arith.constant 0 : i32
    %c0_i32_0 = arith.constant 0 : i32
    %c0_i32_1 = arith.constant 0 : i32
    return %c0_i32, %c0_i32_0 : i32, i32
  }
  func.func @transform_5(%arg0: i32) -> (i32, i32) {
    %c0_i32 = arith.constant 0 : i32
    %c0_i32_0 = arith.constant 0 : i32
    %c0_i32_1 = arith.constant 0 : i32
    return %c0_i32, %c0_i32_0 : i32, i32
  }
  func.func @transform_6(%arg0: i32) -> (i32, i32) {
    %c0_i32 = arith.constant 0 : i32
    %c0_i32_0 = arith.constant 0 : i32
    %c0_i32_1 = arith.constant 0 : i32
    return %c0_i32, %c0_i32_0 : i32, i32
  }
  func.func @transform_7(%arg0: i32) -> (i32, i32) {
    %c0_i32 = arith.constant 0 : i32
    %c0_i32_0 = arith.constant 0 : i32
    %c0_i32_1 = arith.constant 0 : i32
    return %c0_i32, %c0_i32_0 : i32, i32
  }
  func.func @transform_8(%arg0: i32) -> (i32, i32) {
    %c0_i32 = arith.constant 0 : i32
    %c0_i32_0 = arith.constant 0 : i32
    return %arg0, %c0_i32 : i32, i32
  }
  func.func @transform_9(%arg0: i32) -> (i32, i32) {
    %c0_i32 = arith.constant 0 : i32
    %c0_i32_0 = arith.constant 0 : i32
    %c0_i32_1 = arith.constant 0 : i32
    return %c0_i32, %c0_i32_0 : i32, i32
  }
  func.func @transform_10(%arg0: i32) -> (i32, i32) {
    %c0_i32 = arith.constant 0 : i32
    %c0_i32_0 = arith.constant 0 : i32
    %c0_i32_1 = arith.constant 0 : i32
    return %c0_i32, %c0_i32_0 : i32, i32
  }
}

</mosaic_0001>

<bundles_post_ra>
// kernel: tpu_custom_call.1
= control target key start
LH: loop header
LB: loop body
LE: loop exit
PB: predicated region body
PF: predicated region fallthrough
CT: control target
= control target key end

     0   :  { %s2211_s0 = inlined_call_operand.vmem [shape: s32[24,1], index: 0, kind: input, shape index: {}]   ;;  %s2212_s1 = inlined_call_operand.vmem [shape: s32[24,1], index: 1, kind: input, shape index: {}]   ;;  %s2213_s2 = inlined_call_operand.hbm [shape: s32[3,1,8], index: 2, kind: input, shape index: {}]   ;;  %s2214_s3 = inlined_call_operand.vmem [shape: f32[24,32], index: 3, kind: input, shape index: {}]   ;;  %s2215_s4 = inlined_call_operand.vmem [shape: f32[8,32], index: 4, kind: input, shape index: {}]   ;;  %s2216_s5 = inlined_call_operand.vmem [shape: f32[1,32], index: 5, kind: input, shape index: {}]   ;;  %s2217_s6 = inlined_call_operand.hbm [shape: f32[800,128], index: 6, kind: input, shape index: {}]   ;;  %s2218_s7 = inlined_call_operand.vmem [shape: f32[16,128], index: 7, kind: input, shape index: {}]   ;;  %s2219_s8 = inlined_call_operand.hbm [shape: f32[24,32], index: 8, kind: output, shape index: {0}]   ;;  %s2220_s9 = inlined_call_operand.hbm [shape: f32[8,32], index: 9, kind: output, shape index: {1}]   ;;  %s2221_s10 = inlined_call_operand.hbm [shape: f32[1,32], index: 10, kind: output, shape index: {2}]  }
   0x1   :  { %2224 = sst [smem:[#allocation24_spill]] %s2211_s0 }
   0x2   :  { %2225 = sst [smem:[#allocation25_spill]] %s2213_s2 }
   0x3   :  { %2226 = sst [smem:[#allocation26_spill]] %s2217_s6 }
   0x4   :  { %16 = vsyncpa [#allocation10], 0 }
   0x5   :  { %18 = vsyncpa [#allocation10 + $0x1], 0 }
   0x6   :  { %19 = vsyncpa [#allocation13], 0 }
   0x7   :  { %20 = vsyncpa [#allocation11], 0 }
   0x8   :  { %22 = vsyncpa [#allocation11 + $0x1], 0 }
   0x9   :  { %23 = vsyncpa [#allocation16], 0  ;;  %s1914_s13 = smov 0   ;;  %s1916_s14 = smov 0  }
   0xa   :  { %s1918_s15 = smov 0   ;;  %s1920_s16 = smov 0  }
   0xb LB: > { %2227 = sst [smem:[#allocation22_spill]] %s1844_s15  ;;  %s1938_s20 = sadd.s32 4294967295, %s1848_s16   ;;  %s1848_s16 = sphi %s1920_s16, %s2248_s16   ;;  %s1844_s15 = sphi %s1918_s15, %s2245_s15   ;;  %s1840_s14 = sphi %s1916_s14, %s2247_s14   ;;  %s1836_s13 = sphi %s1914_s13, %s2246_s13  }
   0xc   : > { %s2228_s6 = sld [smem:[#allocation26_spill]]  ;;  %p1474_p0 = scmp.ge.s32.totalorder %s1848_s16, 1 }
   0xd   : > { %p102_p1 = scmp.eq.s32.totalorder %s1938_s20, 0  ;;  %p290_p2 = scmp.lt.s32.totalorder %s1848_s16, 4 }
   0xe   : > { %s1850_s22 = smov [#allocation12]   ;;  %s1851_s24 = smov 128  }
   0xf   : > { %p1944_p4 = pnand %p1474_p0, %p290_p2  ;;  %s309_s23 = sshll.u32 %s1850_s22, 4  ;;  %s310_s23 = int_to_ptr.vmem [resolvable:$true] %s309_s23 }
  0x10   : > { %s1852_s25 = smov 8   ;;  %s1473_s26 = sadd.s32 4294967294, %s1848_s16  }
  0x11   : > { %p1536_p5 = pneg %p1944_p4  ;;  %s1954_s27 = sadd.s32 1, %s1848_s16  }
  0x12   : > { %s307_s19 = sshll.u32 %s2228_s6, 4  ;;  %s88_s28 = sadd.s32 1, %s1844_s15  ;;  %s308_s19 = int_to_ptr.hbm [resolvable:$true] %s307_s19 }
  0x13   : > { %p1537_p6 = pnand %p1536_p5, %p102_p1  ;;  %s85_s29 = ssub.s32 %s1848_s16, %s1954_s27 }
  0x14   : > { %p95_p7 = scmp.ne.s32.totalorder %s1844_s15, %s1840_s14  ;;  %p86_p8 = scmp.eq.s32.totalorder %s85_s29, 0 }
  0x15   : > { %1539 = dma.hbm_to_vmem [thread:$0]  (!%p1537_p6), %s308_s19, 12800, %s310_s23, [#allocation13], %s1851_s24, %s1851_s24, %s1852_s25  }
  0x16   : > { %p96_p9 = scmp.eq.s32.totalorder %s1848_s16, 0  ;;  %p101_p10 = scmp.ne.s32.totalorder %s1840_s14, %s1836_s13 }
  0x17   : > { %p2223_p11 = scmp.eq.s32.totalorder %s1938_s20, 2  ;;  %p241_p0 = scmp.eq.s32.totalorder %s1473_s26, 2 }
  0x18   : > { %s1966_s30 = scalar_select %p86_p8, %s1844_s15, %s88_s28  }
  0x19   : > { %p1970_p12 = por %p102_p1, %p101_p10  ;;  %p1976_p13 = por %p2223_p11, %p95_p7 }
  0x1a   : > { %2230 = sst [smem:[#allocation23_spill]] %s1966_s30  ;;  %p97_p2 = por %p96_p9, %p95_p7 }
  0x1b   : > { %s340_s17 = sand.u32 1, %s1844_s15   ;;  %p1981_p5 = por %p241_p0, %p101_p10 }
  0x1c   : > { %p1549_p6 = scmp.lt.s32.totalorder %s1848_s16, 3  ;;  %s2234_s2 = sld [smem:[#allocation25_spill]] }
  0x1d   : > { %s343_s25 = scalar_lea.vmem [#allocation9], %s340_s17  ;;  %s341_s26 = scalar_lea.sflag [#allocation10], %s340_s17 }
  0x1e   : > { %s350_s28 = sshll.u32 %s343_s25, 4  ;;  %p1990_p8 = pnand %p1549_p6, %p97_p2  ;;  %s351_s28 = int_to_ptr.vmem [resolvable:$true] %s350_s28 }
  0x20   : > { %p1692_p9 = pneg %p1990_p8 }
  0x22   : > { %s346_s23 = scalar_lea.hbm %s2234_s2, %s1848_s16 }
  0x23   : > { %s348_s24 = sshll.u32 %s346_s23, 4  ;;  %s1695_s23 = scalar_lea.hbm %s2234_s2, 3  ;;  %s349_s24 = int_to_ptr.hbm [resolvable:$true] %s348_s24 }
  0x24   : > { %s1688_s6 = sshra.s32 %s349_s24, 4  ;;  %s1689_s6 = int_to_ptr.hbm [resolvable:$true] %s1688_s6 }
  0x25   : > { %s1690_s30 = scalar_lea.hbm %s1689_s6, 1  ;;  %p1696_p2 = scmp.lt.s32.totalorder %s1689_s6, %s2234_s2 }
  0x26   : > { %p1691_p7 = scmp.ne.s32.totalorder %s1689_s6, %s1690_s30  ;;  %p1697_p6 = scmp.lt.s32.totalorder %s1695_s23, %s1690_s30 }
  0x28   : > { %p1693_p10 = pnand %p1692_p9, %p1691_p7  ;;  %p1698_p11 = por %p1697_p6, %p1696_p2 }
  0x2a   : > { %p1694_p0 = pneg %p1693_p10 }
  0x2c   : > { %p1699_p3 = pnand %p1698_p11, %p1694_p0 }
  0x2e   : > { %1702 = shalt.err (!%p1699_p3)
}
  0x2f   : > { %1543 = dma.hbm_to_vmem [thread:$0]  (!%p1990_p8), %s349_s24, 16, %s351_s28, %s341_s26  }
  0x30   : > { %366 = sbr.rel (%p1944_p4) target bundleno = 2262 (0x8d6), region = 52  ;;  %s2007_s17 = sand.u32 (!%p1944_p4), 1, %s1840_s14  }
  0x31   : > { %s369_s19 = scalar_lea.sflag (!%p1944_p4), [#allocation10], %s2007_s17 }
  0x35   : > { %1819 = dma.done.wait (%p1970_p12), %s369_s19, 16  }
  0x36   : > { %1821 = vsyncadd (%p1970_p12), %s369_s19, 4294967280 }
  0x37   : > { %1823 = dma.done.wait (%p102_p1), [#allocation13], 12800  }
  0x38   : > { %1825 = vsyncadd (%p102_p1), [#allocation13], 4294954496  ;;  %s1479_s6 = sshll.u32 %s2007_s17, 3  ;;  %p425_p3 = scmp.lt.s32.totalorder %s1938_s20, 2 }
  0x39   : > { %s1483_s15 = sshll.u32 %s1938_s20, 3  ;;  %s2236_s0 = sld [smem:[#allocation24_spill]] }
  0x3a   : > { %s426_s21 = scalar_select %p425_p3, %s1938_s20, 2 }
  0x3b   : > { %s2037_s2 = scalar_lea.vmem [#allocation14], %s1479_s6  ;;  %p2237_p1 = scmp.ne.s32.totalorder %s1938_s20, 0 }
  0x3c   : > { %s2023_s30 = sshll.u32 %s426_s21, 3 }
  0x3d   : > { %s432_s23 = scalar_lea.vmem %s2212_s1, %s2023_s30  ;;  %s436_s22 = scalar_lea.vmem %s2214_s3, %s2023_s30 }
  0x3e   : > { %441 = sbr.rel (%p2237_p1) target bundleno = 365 (0x16d), region = 64 }
  0x3f   : > { %s428_s28 = scalar_lea.vmem %s2236_s0, %s2023_s30 }
  0x43   : > { %v446_v0 = vld [vmem:[#allocation12 + $0x38] sm:$0xff]  ;;  %v445_v2 = vld [vmem:[#allocation12 + $0x30] sm:$0xff]  ;;  %vm449_vm0 = vcmask 261120   ;;  %vm608_vm1 = vcmask 7168   ;;  %v1853_v4 = vmov 0.0   ;;  %v444_v5 = vld [vmem:[#allocation12 + $0x28] sm:$0xff] }
  0x44   : > { %v541_v1 = vld [vmem:[#allocation12 + $0x58] sm:$0xff]  ;;  %465 = vmatpush.msra.mxu0 %v446_v0  ;;  %v540_v3 = vld [vmem:[#allocation12 + $0x50] sm:$0xff]  ;;  %607 = vst.msk [vmem:[#allocation7] sm:$0xff] %vm449_vm0, %v1853_v4  ;;  %v539_v6 = vld [vmem:[#allocation12 + $0x48] sm:$0xff]  ;;  %vm575_vm2 = vcmask 253952   ;;  %vm510_vm3 = vcmask 523264  }
  0x45   : > { %558 = vmatpush.msra.mxu3 %v541_v1  ;;  %609 = vst.msk [vmem:[#allocation8] sm:$0xff] %vm608_vm1, %v1853_v4  ;;  %v443_v7 = vld [vmem:[#allocation12 + $0x20] sm:$0xff]  ;;  %v442_v9 = vld [vmem:[%s2215_s4] sm:$0xff]  ;;  %v484_v15 = vld [vmem:[#allocation12 + $0x68] sm:$0xff]  ;;  %vm605_vm4 = vcmask 516096  }
  0x46   : > { %466 = vmatpush.msra.mxu0 %v445_v2  ;;  %v538_v8 = vld [vmem:[#allocation12 + $0x40] sm:$0xff]  ;;  %v537_v10 = vld [vmem:[%s2216_s5] sm:$0x1]  ;;  %v486_v11 = vld [vmem:[#allocation12 + $0x78] sm:$0xff] }
  0x47   : > { %559 = vmatpush.msra.mxu3 %v540_v3  ;;  %v515_v12 = vld [vmem:[#allocation12 + $0x98] sm:$0xff]  ;;  %502 = vmatpush.msra.mxu1 %v486_v11  ;;  %v485_v13 = vld [vmem:[#allocation12 + $0x70] sm:$0xff]  ;;  %v513_v16 = vld [vmem:[#allocation12 + $0x88] sm:$0xff] }
  0x48   : > { %467 = vmatpush.msra.mxu0 %v444_v5  ;;  %528 = vmatpush.msra.mxu2 %v515_v12  ;;  %v514_v14 = vld [vmem:[#allocation12 + $0x90] sm:$0xff]  ;;  %v580_v17 = vld [vmem:[#allocation12 + $0xd8] sm:$0xff]  ;;  %v483_v18 = vld [vmem:[#allocation12 + $0x60] sm:$0xff] }
  0x49   : > { %560 = vmatpush.msra.mxu3 %v539_v6  ;;  %503 = vmatpush.msra.mxu1 %v485_v13  ;;  %v512_v19 = vld [vmem:[#allocation12 + $0x80] sm:$0xff]  ;;  %v1597_v20 = vld [vmem:[%s2218_s7 + $0x1] ss:$0 sm:$0xff]  ;;  %v578_v22 = vld [vmem:[#allocation12 + $0xc8] sm:$0xff] }
  0x4a   : > { %468 = vmatpush.msra.mxu0 %v443_v7  ;;  %529 = vmatpush.msra.mxu2 %v514_v14  ;;  %v579_v21 = vld [vmem:[#allocation12 + $0xd0] sm:$0xff]  ;;  %v577_v25 = vld [vmem:[#allocation12 + $0xc0] sm:$0xff] }
  0x4b   : > { %561 = vmatpush.msra.mxu3 %v538_v8  ;;  %1485 = vmatmul.msk.f32.vlgmr.msra.gmra.mxu0 %vm449_vm0, %v442_v9  ;;  %v542_v27 = vld [vmem:[%s2218_s7 + $0x2] sm:$0x1]  ;;  %v581_v48 = vld [vmem:[%s2218_s7 + $0x3] sm:$0x1] }
  0x4c   : > { %1488 = vmatmul.msk.f32.vlgmr.msra.gmra.mxu3 %vm449_vm0, %v537_v10  ;;  %504 = vmatpush.msra.mxu1 %v484_v15 }
  0x4d   : > { %530 = vmatpush.msra.mxu2 %v513_v16  ;;  %597 = vmatpush.msrb.mxu0 %v580_v17 }
  0x4e   : > { %505 = vmatpush.msra.mxu1 %v483_v18 }
  0x4f   : > { %531 = vmatpush.msra.mxu2 %v512_v19  ;;  %598 = vmatpush.msrb.mxu0 %v579_v21 }
  0x51   : > { %599 = vmatpush.msrb.mxu0 %v578_v22 }
  0x53   : > { %600 = vmatpush.msrb.mxu0 %v577_v25 }
  0xc8   : > { %v470_v23 = vpop.f32.mrf.mxu0 }
  0xc9   : > { %v471_v24 = vadd.f32 %v1597_v20, %v470_v23 }
  0xcb   : > { %v474_v26 = vand.u32 2147483647, %v471_v24  ;;  %v473_v40 = vmax.f32 %v471_v24, 0.0 }
  0xcd   : > { %v475_v28 = vsub.f32 0.0, %v474_v26 }
  0xcf   : > { %v563_v29 = vpop.f32.mrf.mxu3  ;;  %v476_v30 = vmul.f32 1.442695, %v475_v28 }
  0xd0   : > { %v564_v31 = vadd.f32 %v563_v29, %v542_v27 }
  0xd1   : > { %1598 = vpow2.f32 %v476_v30 }
  0xd2   : > { %v567_v32 = vand.u32 2147483647, %v564_v31  ;;  %v566_v44 = vmax.f32 %v564_v31, 0.0 }
  0xd4   : > { %v568_v33 = vsub.f32 0.0, %v567_v32 }
  0xd6   : > { %v569_v34 = vmul.f32 1.442695, %v568_v33 }
  0xd7   : > { %v1599_v35 = vpop.eup %1598 }
  0xd8   : > { %1600 = vpow2.f32 %v569_v34  ;;  %v478_v36 = vadd.f32 1.0, %v1599_v35 }
  0xda   : > { %1602 = vlog2.f32 %v478_v36 }
  0xde   : > { %v1601_v37 = vpop.eup %1600 }
  0xdf   : > { %v571_v38 = vadd.f32 1.0, %v1601_v37 }
  0xe0   : > { %v1603_v39 = vpop.eup %1602 }
  0xe1   : > { %1604 = vlog2.f32 %v571_v38  ;;  %v480_v41 = vmul.f32 0.6931472, %v1603_v39 }
  0xe3   : > { %v481_v42 = vadd.f32 %v480_v41, %v473_v40 }
  0xe5   : > { %482 = vst.msk [vmem:[#allocation2] sm:$0xff] %vm449_vm0, %v481_v42  ;;  %1486 = vmatmul.msk.f32.vlgmr.msra.gmra.mxu1 %vm449_vm0, %v481_v42  ;;  %1487 = vmatmul.msk.f32.vlgmr.msra.gmra.mxu2 %vm449_vm0, %v481_v42 }
  0xe7   : > { %v1605_v43 = vpop.eup %1604 }
  0xe8   : > { %v573_v45 = vmul.f32 0.6931472, %v1605_v43 }
  0xea   : > { %v574_v46 = vadd.f32 %v573_v45, %v566_v44 }
  0xec   : > { %576 = vst.msk [vmem:[#allocation5] sm:$0x1] %vm575_vm2, %v574_v46  ;;  %1489 = vmatmul.msk.f32.vlgmr.msrb.gmra.mxu0 %vm449_vm0, %v574_v46 }
 0x162   : > { %v507_v47 = vpop.f32.mrf.mxu1 }
 0x163   : > { %511 = vst.msk [vmem:[#allocation3] sm:$0xff] %vm510_vm3, %v507_v47 }
 0x168   : > { %v533_v49 = vpop.f32.mrf.mxu2 }
 0x169   : > { %v602_v50 = vpop.f32.mrf.mxu0  ;;  %536 = vst.msk [vmem:[#allocation4] sm:$0xff] %vm510_vm3, %v533_v49 }
 0x16a   : > { %v603_v51 = vadd.f32 %v602_v50, %v581_v48 }
 0x16c   : > { %606 = vst.msk [vmem:[#allocation6] sm:$0x1] %vm605_vm4, %v603_v51 }
 0x16d PF: > { %v630_v52 = vld [vmem:[#allocation12 + $0x18] sm:$0xff]  ;;  %v629_v53 = vld [vmem:[#allocation12 + $0x10] sm:$0xff]  ;;  %v1854_v54 = vmov 0   ;;  %v628_v56 = vld [vmem:[#allocation12 + $0x8] sm:$0xff]  ;;  %vm633_vm5 = vcmask 261120   ;;  %v612_v60 = vlaneseq  ;;  %v1855_v1 = vmov 0.0  }
 0x16e   : > { %649 = vmatpush.msra.mxu0 %v630_v52  ;;  %1606 = vset.pattern.permute.xlu0 %v1854_v54  ;;  %v611_v55 = vld [vmem:[%s432_s23] sm:$0xff]  ;;  %v627_v57 = vld [vmem:[#allocation12] sm:$0xff]  ;;  %vm668_vm7 = vcmask 64512   ;;  %v716_v7 = vld [vmem:[#allocation12 + $0xa8] sm:$0xff]  ;;  %vm767_vm9 = vcmask 523264   ;;  %s2239_s6 = scalar_lea.vmem [#allocation9], %s2007_s17 }
 0x16f   : > { %621 = vperm.xlu0 %1606, %v611_v55   ;;  %v2073_v58 = vld [vmem:[%s436_s22] sm:$0xff]  ;;  %v2083_v61 = vand.u32 127, %v612_v60  ;;  %v666_v0 = vld [vmem:[#allocation3] sm:$0xff]  ;;  %v762_v23 = vld [vmem:[#allocation12 + $0x108] sm:$0xff]  ;;  %vm888_vm12 = vcmask 7168   ;;  %p1501_p4 = scmp.ne.s32.totalorder %s1938_s20, 2 }
 0x170   : > { %650 = vmatpush.msra.mxu0 %v629_v53  ;;  %v610_v59 = vld [vmem:[%s428_s28] sm:$0xff]  ;;  %v667_v63 = vld [vmem:[#allocation4] sm:$0xff]  ;;  %710 = vmatpush.msra.mxu2 %v666_v0 }
 0x171   : > { %687 = vmatpush.msra.mxu3 %v667_v63  ;;  %v718_v3 = vld [vmem:[#allocation12 + $0xb8] sm:$0xff]  ;;  %v717_v5 = vld [vmem:[#allocation12 + $0xb0] sm:$0xff]  ;;  %v715_v8 = vld [vmem:[#allocation12 + $0xa0] sm:$0xff] }
 0x172   : > { %651 = vmatpush.msra.mxu0 %v628_v56  ;;  %v1607_v9 = vld [vmem:[%s2218_s7] ss:$0 sm:$0xff]  ;;  %v764_v21 = vld [vmem:[#allocation12 + $0x118] sm:$0xff]  ;;  %v761_v24 = vld [vmem:[#allocation12 + $0x100] sm:$0xff] }
 0x173   : > { %734 = vmatpush.msrb.mxu3 %v718_v3  ;;  %779 = vmatpush.msra.mxu1 %v764_v21  ;;  %v763_v22 = vld [vmem:[#allocation12 + $0x110] sm:$0xff]  ;;  %v760_v25 = vld [vmem:[#allocation12 + $0xf8] sm:$0xff]  ;;  %v758_v28 = vld [vmem:[#allocation12 + $0xe8] sm:$0xff] }
 0x174   : > { %652 = vmatpush.msra.mxu0 %v627_v57  ;;  %v759_v26 = vld [vmem:[#allocation12 + $0xf0] sm:$0xff]  ;;  %v757_v29 = vld [vmem:[#allocation12 + $0xe0] sm:$0xff]  ;;  %v1608_v32 = vld [vmem:[#allocation6] ss:$0 sm:$0xff] }
 0x175   : > { %1492 = vmatmul.msk.f32.vlgmr.msra.gmra.mxu0 %vm633_vm5, %v2073_v58  ;;  %735 = vmatpush.msrb.mxu3 %v717_v5  ;;  %v807_v45 = vld [vmem:[#allocation12 + $0x158] sm:$0xff]  ;;  %v806_v46 = vld [vmem:[#allocation12 + $0x150] sm:$0xff]  ;;  %v805_v47 = vld [vmem:[#allocation12 + $0x148] sm:$0xff]  ;;  %v847_v5 = vstv %s1483_s15 }
 0x176   : > { %780 = vmatpush.msra.mxu1 %v763_v22  ;;  %821 = vmatpush.msrb.mxu2 %v807_v45  ;;  %v804_v48 = vld [vmem:[#allocation12 + $0x140] sm:$0xff]  ;;  %v803_v49 = vld [vmem:[#allocation12 + $0x138] sm:$0xff]  ;;  %v802_v50 = vld [vmem:[#allocation12 + $0x130] sm:$0xff] }
 0x177   : > { %615 = vperm.xlu0 %1606, %v610_v59   ;;  %736 = vmatpush.msrb.mxu3 %v716_v7  ;;  %v801_v51 = vld [vmem:[#allocation12 + $0x128] sm:$0xff]  ;;  %v800_v52 = vld [vmem:[#allocation12 + $0x120] sm:$0xff]  ;;  %v1609_v53 = vld [vmem:[%s2218_s7 + $0x4] ss:$0 sm:$0xff]  ;;  %v848_v7 = vadd.s32 %v847_v5, %v2083_v61 }
 0x178   : > { %781 = vmatpush.msra.mxu1 %v762_v23  ;;  %822 = vmatpush.msrb.mxu2 %v806_v46  ;;  %v883_v23 = vld [vmem:[#allocation8] sm:$0xff] }
 0x179   : > { %737 = vmatpush.msrb.mxu3 %v715_v8  ;;  %v1611_v8 = vld [vmem:[%s2239_s6] ss:$0 sm:$0xff]  ;;  %vm849_vm10 = vcmp.lt.s32.totalorder %v848_v7, 20 }
 0x17a   : > { %782 = vmatpush.msra.mxu1 %v761_v24  ;;  %823 = vmatpush.msrb.mxu2 %v805_v47 }
 0x17c   : > { %783 = vmatpush.msra.mxu1 %v760_v25  ;;  %824 = vmatpush.msrb.mxu2 %v804_v48 }
 0x17e   : > { %784 = vmatpush.msra.mxu1 %v759_v26  ;;  %825 = vmatpush.msrb.mxu2 %v803_v49  ;;  %v857_v26 = vld [vmem:[#allocation7] sm:$0xff] }
 0x180   : > { %785 = vmatpush.msra.mxu1 %v758_v28  ;;  %826 = vmatpush.msrb.mxu2 %v802_v50 }
 0x182   : > { %786 = vmatpush.msra.mxu1 %v757_v29  ;;  %827 = vmatpush.msrb.mxu2 %v801_v51 }
 0x184   : > { %828 = vmatpush.msrb.mxu2 %v800_v52 }
 0x1e1   : > { %v622_v62 = vpop.permute.xlu0 %621 }
 0x1e2   : > { %vm623_vm6 = vcmp.eq.s32.totalorder %v2083_v61, %v622_v62 }
 0x1e3   : > { %v1491_v2 = vsel %vm623_vm6, 1.0, %v1855_v1 }
 0x1e4   : > { %1493 = vmatmul.msk.f32.vlgmr.msra.gmra.mxu3 %vm668_vm7, %v1491_v2 }
 0x1e9   : > { %v616_v4 = vpop.permute.xlu0 %615 }
 0x1ea   : > { %vm617_vm8 = vcmp.eq.s32.totalorder %v2083_v61, %v616_v4 }
 0x1eb   : > { %v1490_v6 = vsel %vm617_vm8, 1.0, %v1855_v1 }
 0x1ec   : > { %1494 = vmatmul.msk.f32.vlgmr.msra.gmra.mxu2 %vm668_vm7, %v1490_v6  ;;  %v846_v6 = vshrl.u32 %v612_v60, 7 }
 0x1ee   : > { %vm853_vm11 = vcmp.eq.s32.totalorder %v846_v6, %v1611_v8 }
 0x1f2   : > { %v654_v10 = vpop.f32.mrf.mxu0 }
 0x1f3   : > { %v655_v11 = vadd.f32 %v1607_v9, %v654_v10  ;;  %v1498_v9 = vsel %vm849_vm10, 1.0, %v1855_v1  ;;  %v1499_v10 = vsel %vm853_vm11, 1.0, %v1855_v1 }
 0x1f5   : > { %v658_v12 = vand.u32 2147483647, %v655_v11  ;;  %v657_v18 = vmax.f32 %v655_v11, 0.0  ;;  %v856_v11 = vmul.f32 %v1499_v10, %v1498_v9 }
 0x1f7   : > { %v659_v13 = vsub.f32 0.0, %v658_v12  ;;  %v1610_v12 = vld [vmem:[%s2218_s7 + $0x5] ss:$0 sm:$0xff] }
 0x1f9   : > { %v660_v14 = vmul.f32 1.442695, %v659_v13  ;;  %v884_v13 = vsel %vm668_vm7, %v856_v11, 0.0 }
 0x1fa   : > { %885 = vadd.xlane.f32.xlu1 %v884_v13 }
 0x1fb   : > { %1612 = vpow2.f32 %v660_v14 }
 0x201   : > { %v1613_v15 = vpop.eup %1612 }
 0x202   : > { %v662_v16 = vadd.f32 1.0, %v1613_v15 }
 0x204   : > { %1614 = vlog2.f32 %v662_v16 }
 0x20a   : > { %v1615_v17 = vpop.eup %1614 }
 0x20b   : > { %v664_v19 = vmul.f32 0.6931472, %v1615_v17 }
 0x20d   : > { %v665_v20 = vadd.f32 %v664_v19, %v657_v18 }
 0x20f   : > { %1495 = vmatmul.msk.f32.vlgmr.msrb.gmra.mxu3 %vm633_vm5, %v665_v20 }
 0x267   : > { %v689_v27 = vpop.f32.mrf.mxu3 }
 0x26d   : > { %v886_v24 = vpop.xlane.xlu1 %885 }
 0x26e   : > { %v887_v25 = vadd.f32 %v886_v24, %v883_v23 }
 0x26f   : > { %v712_v30 = vpop.f32.mrf.mxu2 }
 0x270   : > { %v713_v31 = vadd.f32 %v712_v30, %v689_v27  ;;  %889 = vst.msk [vmem:[#allocation8] sm:$0xff] %vm888_vm12, %v887_v25 }
 0x292   : > { %v739_v33 = vpop.f32.mrf.mxu3 }
 0x293   : > { %v742_v34 = vadd.f32 %v739_v33, %v713_v31 }
 0x295   : > { %v747_v35 = vadd.f32 %v1608_v32, %v742_v34 }
 0x297   : > { %v749_v36 = vand.u32 2147483647, %v747_v35  ;;  %v748_v42 = vmax.f32 %v747_v35, 0.0 }
 0x299   : > { %v750_v37 = vsub.f32 0.0, %v749_v36 }
 0x29b   : > { %v751_v38 = vmul.f32 1.442695, %v750_v37 }
 0x29d   : > { %1616 = vpow2.f32 %v751_v38 }
 0x2a3   : > { %v1617_v39 = vpop.eup %1616 }
 0x2a4   : > { %v753_v40 = vadd.f32 1.0, %v1617_v39 }
 0x2a6   : > { %1618 = vlog2.f32 %v753_v40 }
 0x2ac   : > { %v1619_v41 = vpop.eup %1618 }
 0x2ad   : > { %v755_v43 = vmul.f32 0.6931472, %v1619_v41 }
 0x2af   : > { %v756_v44 = vadd.f32 %v755_v43, %v748_v42 }
 0x2b1   : > { %1496 = vmatmul.msk.f32.vlgmr.msra.gmra.mxu1 %vm767_vm9, %v756_v44 }
 0x32e   : > { %v788_v54 = vpop.f32.mrf.mxu1 }
 0x32f   : > { %v789_v55 = vadd.f32 %v1609_v53, %v788_v54 }
 0x331   : > { %v792_v56 = vand.u32 2147483647, %v789_v55  ;;  %v791_v2 = vmax.f32 %v789_v55, 0.0 }
 0x333   : > { %v793_v57 = vsub.f32 0.0, %v792_v56 }
 0x335   : > { %v794_v59 = vmul.f32 1.442695, %v793_v57 }
 0x337   : > { %1620 = vpow2.f32 %v794_v59 }
 0x33d   : > { %v1621_v62 = vpop.eup %1620 }
 0x33e   : > { %v796_v63 = vadd.f32 1.0, %v1621_v62 }
 0x340   : > { %1622 = vlog2.f32 %v796_v63 }
 0x346   : > { %v1623_v0 = vpop.eup %1622 }
 0x347   : > { %v798_v3 = vmul.f32 0.6931472, %v1623_v0 }
 0x349   : > { %v799_v4 = vadd.f32 %v798_v3, %v791_v2 }
 0x34b   : > { %1497 = vmatmul.msk.f32.vlgmr.msrb.gmra.mxu2 %vm767_vm9, %v799_v4 }
 0x3ce   : > { %v830_v14 = vpop.f32.mrf.mxu2 }
 0x3cf   : > { %v831_v60 = vadd.f32 %v1610_v12, %v830_v14 }
 0x3d1   : > { %v834_v61 = vand.u32 2147483647, %v831_v60  ;;  %v833_v1 = vmax.f32 %v831_v60, 0.0 }
 0x3d3   : > { %v835_v15 = vsub.f32 0.0, %v834_v61 }
 0x3d5   : > { %v836_v16 = vmul.f32 1.442695, %v835_v15 }
 0x3d7   : > { %1624 = vpow2.f32 %v836_v16 }
 0x3dd   : > { %v1625_v17 = vpop.eup %1624 }
 0x3de   : > { %v838_v18 = vadd.f32 1.0, %v1625_v17 }
 0x3e0   : > { %1626 = vlog2.f32 %v838_v18 }
 0x3e6   : > { %v1627_v19 = vpop.eup %1626 }
 0x3e7   : > { %v840_v20 = vmul.f32 0.6931472, %v1627_v19 }
 0x3e9   : > { %v841_v21 = vadd.f32 %v840_v20, %v833_v1 }
 0x3eb   : > { %v842_v22 = vadd.f32 %v841_v21, %v2073_v58  ;;  %876 = vmatpush.msrb.mxu0 %v841_v21 }
 0x3ec   : > { %1500 = vmatmul.msk.f32.vlgmr.msrb.gmra.mxu0 %vm668_vm7, %v856_v11 }
 0x3ed   : > { %843 = vst.msk [vmem:[%s2037_s2] sm:$0xff] %vm633_vm5, %v842_v22 }
 0x468   : > { %893 = sbr.rel (%p1501_p4) target bundleno = 2236 (0x8bc), region = 68 }
 0x469   : > { %v878_v27 = vpop.f32.mrf.mxu0 }
 0x46a   : > { %v881_v28 = vadd.f32 %v878_v27, %v857_v26 }
 0x46c   : > { %882 = vst.msk [vmem:[#allocation7] sm:$0xff] %vm633_vm5, %v881_v28 }
 0x46d   : > { %v894_v29 = vld [vmem:[#allocation8] sm:$0xff]  ;;  %v1856_v58 = vmov 0   ;;  %v974_v33 = vld [vmem:[#allocation12 + $0x1a8] sm:$0xff]  ;;  %v973_v36 = vld [vmem:[#allocation12 + $0x1a0] sm:$0xff]  ;;  %vm1296_vm1 = vcmask 253952  }
 0x46e   : > { %1628 = vset.pattern.permute.xlu0 %v1856_v58  ;;  %v895_v30 = vmax.f32 %v894_v29, 1.0  ;;  %v976_v31 = vld [vmem:[#allocation12 + $0x1b8] sm:$0xff]  ;;  %v975_v32 = vld [vmem:[#allocation12 + $0x1b0] sm:$0xff]  ;;  %v2118_v37 = vld [vmem:[#allocation5] sm:$0x1] }
 0x46f   : > { %992 = vmatpush.msra.mxu2 %v976_v31  ;;  %v926_v34 = vld [vmem:[#allocation12 + $0x198] sm:$0xff]  ;;  %v925_v38 = vld [vmem:[#allocation12 + $0x190] sm:$0xff]  ;;  %v924_v40 = vld [vmem:[#allocation12 + $0x188] sm:$0xff] }
 0x470   : > { %899 = vperm.xlu0 %1628, %v895_v30   ;;  %v922_v35 = vld [vmem:[#allocation12 + $0x178] sm:$0xff]  ;;  %942 = vmatpush.msra.mxu0 %v926_v34  ;;  %v921_v39 = vld [vmem:[#allocation12 + $0x170] sm:$0xff]  ;;  %v920_v41 = vld [vmem:[#allocation12 + $0x168] sm:$0xff] }
 0x471   : > { %993 = vmatpush.msra.mxu2 %v975_v32  ;;  %965 = vmatpush.msra.mxu1 %v922_v35  ;;  %v923_v42 = vld [vmem:[#allocation12 + $0x180] sm:$0xff]  ;;  %v917_v44 = vld [vmem:[#allocation2] sm:$0xff]  ;;  %v1019_v63 = vld [vmem:[#allocation12 + $0x1e8] sm:$0xff] }
 0x472   : > { %943 = vmatpush.msra.mxu0 %v925_v38  ;;  %v919_v43 = vld [vmem:[#allocation12 + $0x160] sm:$0xff]  ;;  %v1021_v59 = vld [vmem:[#allocation12 + $0x1f8] sm:$0xff]  ;;  %v1020_v62 = vld [vmem:[#allocation12 + $0x1f0] sm:$0xff] }
 0x473   : > { %994 = vmatpush.msra.mxu2 %v974_v33  ;;  %966 = vmatpush.msra.mxu1 %v921_v39  ;;  %v2123_v54 = vld [vmem:[#allocation7] sm:$0xff]  ;;  %v1018_v0 = vld [vmem:[#allocation12 + $0x1e0] sm:$0xff]  ;;  %v1017_v2 = vld [vmem:[#allocation12 + $0x1d8] sm:$0xff] }
 0x474   : > { %944 = vmatpush.msra.mxu0 %v924_v40  ;;  %1035 = vmatpush.msra.mxu3 %v1021_v59  ;;  %v1016_v3 = vld [vmem:[#allocation12 + $0x1d0] sm:$0xff]  ;;  %v1015_v4 = vld [vmem:[#allocation12 + $0x1c8] sm:$0xff]  ;;  %v1014_v5 = vld [vmem:[#allocation12 + $0x1c0] sm:$0xff]  ;;  %v1105_v40 = vsel %vm633_vm5, %v2123_v54, 0.0 }
 0x475   : > { %995 = vmatpush.msra.mxu2 %v973_v36  ;;  %967 = vmatpush.msra.mxu1 %v920_v41  ;;  %v1629_v11 = vld [vmem:[%s2218_s7 + $0x6] ss:$0 sm:$0xff]  ;;  %v1062_v21 = vld [vmem:[#allocation12 + $0x230] sm:$0xff]  ;;  %v1061_v22 = vld [vmem:[#allocation12 + $0x228] sm:$0xff] }
 0x476   : > { %1504 = vmatmul.msk.f32.vlgmr.msra.gmra.mxu2 %vm633_vm5, %v2118_v37  ;;  %945 = vmatpush.msra.mxu0 %v923_v42  ;;  %v1063_v20 = vld [vmem:[#allocation12 + $0x238] sm:$0xff]  ;;  %v1060_v23 = vld [vmem:[#allocation12 + $0x220] sm:$0xff]  ;;  %v1058_v25 = vld [vmem:[#allocation12 + $0x210] sm:$0xff]  ;;  %v1106_v42 = vrot.slane %v1105_v40, 4 }
 0x477   : > { %968 = vmatpush.msra.mxu1 %v919_v43  ;;  %1036 = vmatpush.msra.mxu3 %v1020_v62  ;;  %v1059_v24 = vld [vmem:[#allocation12 + $0x218] sm:$0xff]  ;;  %v1057_v26 = vld [vmem:[#allocation12 + $0x208] sm:$0xff]  ;;  %v1056_v27 = vld [vmem:[#allocation12 + $0x200] sm:$0xff] }
 0x478   : > { %1503 = vmatmul.msk.f32.vlgmr.msra.gmra.mxu1 %vm633_vm5, %v917_v44  ;;  %1077 = vmatpush.msrb.mxu0 %v1063_v20  ;;  %v1630_v28 = vld [vmem:[%s2218_s7 + $0x7] ss:$0 sm:$0xff]  ;;  %v1124_v43 = vld [vmem:[#allocation12 + $0x250] sm:$0xff]  ;;  %v1107_v44 = vadd.f32 %v1106_v42, %v1105_v40  ;;  %v1217_v20 = vld [vmem:[#allocation12 + $0x2c8] sm:$0xff] }
 0x479   : > { %1037 = vmatpush.msra.mxu3 %v1019_v63  ;;  %v1125_v41 = vld [vmem:[#allocation12 + $0x258] sm:$0xff] }
 0x47a   : > { %1078 = vmatpush.msrb.mxu0 %v1062_v21  ;;  %1165 = vmatpush.msrb.mxu2 %v1125_v41  ;;  %v1176_v63 = vld [vmem:[#allocation12 + $0x298] sm:$0xff]  ;;  %v1216_v21 = vld [vmem:[#allocation12 + $0x2c0] sm:$0xff] }
 0x47b   : > { %1038 = vmatpush.msra.mxu3 %v1018_v0  ;;  %v1175_v0 = vld [vmem:[#allocation12 + $0x290] sm:$0xff]  ;;  %v1260_v42 = vld [vmem:[#allocation12 + $0x318] sm:$0xff] }
 0x47c   : > { %1079 = vmatpush.msrb.mxu0 %v1061_v22  ;;  %1166 = vmatpush.msrb.mxu2 %v1124_v43  ;;  %v1259_v43 = vld [vmem:[#allocation12 + $0x310] sm:$0xff] }
 0x47d   : > { %1039 = vmatpush.msra.mxu3 %v1017_v2 }
 0x47e   : > { %1080 = vmatpush.msrb.mxu0 %v1060_v23  ;;  %v1215_v23 = vld [vmem:[#allocation12 + $0x2b8] sm:$0xff] }
 0x47f   : > { %1040 = vmatpush.msra.mxu3 %v1016_v3  ;;  %v1174_v3 = vld [vmem:[#allocation12 + $0x288] sm:$0xff] }
 0x480   : > { %1081 = vmatpush.msrb.mxu0 %v1059_v24  ;;  %v1214_v24 = vld [vmem:[#allocation12 + $0x2b0] sm:$0xff] }
 0x481   : > { %1041 = vmatpush.msra.mxu3 %v1015_v4 }
 0x482   : > { %1082 = vmatpush.msrb.mxu0 %v1058_v25  ;;  %v1213_v25 = vld [vmem:[#allocation12 + $0x2a8] sm:$0xff] }
 0x483   : > { %1042 = vmatpush.msra.mxu3 %v1014_v5 }
 0x484   : > { %1083 = vmatpush.msrb.mxu0 %v1057_v26 }
 0x485   : > { %1273 = vmatpush.msrb.mxu3 %v1260_v42 }
 0x486   : > { %1084 = vmatpush.msrb.mxu0 %v1056_v27  ;;  %v1212_v27 = vld [vmem:[#allocation12 + $0x2a0] sm:$0xff] }
 0x487   : > { %1274 = vmatpush.msrb.mxu3 %v1259_v43 }
 0x4e2   : > { %v900_v45 = vpop.permute.xlu0 %899 }
 0x4e3   : > { %1632 = vrcp.f32 %v900_v45  ;;  %v913_v49 = vand.u32 2147483648, %v900_v45  ;;  %v911_v51 = vand.u32 2147483647, %v900_v45  ;;  %vm907_vm14 = vweird.f32 %v900_v45 }
 0x4e5   : > { %v914_v53 = vor.u32 1.1754944e-38, %v913_v49  ;;  %vm912_vm0 = vcmp.eq.f32.partialorder %v911_v51, 8.507059e+37  ;;  %v1128_v51 = vld [vmem:[#allocation12 + $0x270] sm:$0xff] }
 0x4e9   : > { %v1633_v46 = vpop.eup %1632 }
 0x4ea   : > { %v903_v47 = vmul.f32 %v1633_v46, %v900_v45  ;;  %vm908_vm13 = vweird.f32 %v1633_v46  ;;  %v1123_v45 = vld [vmem:[#allocation12 + $0x248] sm:$0xff] }
 0x4eb   : > { %vm909_vm15 = vmor %vm907_vm14, %vm908_vm13  ;;  %1167 = vmatpush.msrb.mxu2 %v1123_v45  ;;  %v1257_v45 = vld [vmem:[#allocation12 + $0x300] sm:$0xff] }
 0x4ec   : > { %v904_v48 = vsub.f32 1.0, %v903_v47  ;;  %v1129_v47 = vld [vmem:[#allocation12 + $0x278] sm:$0xff] }
 0x4ed   : > { %1145 = vmatpush.msrb.mxu1 %v1129_v47  ;;  %v1255_v47 = vld [vmem:[#allocation12 + $0x2f0] sm:$0xff] }
 0x4ee   : > { %v905_v50 = vmul.f32 %v1633_v46, %v904_v48  ;;  %v1122_v48 = vld [vmem:[#allocation12 + $0x240] sm:$0xff] }
 0x4ef   : > { %1168 = vmatpush.msrb.mxu2 %v1122_v48  ;;  %1146 = vmatpush.msrb.mxu1 %v1128_v51  ;;  %v1254_v48 = vld [vmem:[#allocation12 + $0x2e8] sm:$0xff] }
 0x4f0   : > { %v906_v52 = vadd.f32 %v1633_v46, %v905_v50  ;;  %v1631_v50 = vld [vmem:[%s2218_s7 + $0x8] ss:$0 sm:$0xff]  ;;  %1508 = vmatmul.msk.f32.vlgmr.msrb.gmra.mxu2 %vm633_vm5, %v2118_v37  ;;  %v1173_v37 = vld [vmem:[#allocation12 + $0x280] sm:$0xff] }
 0x4f2   : > { %v910_v55 = vsel %vm909_vm15, %v1633_v46, %v906_v52  ;;  %v1108_v46 = vrot.slane %v1107_v44, 2 }
 0x4f3   : > { %v915_v56 = vsel %vm912_vm0, %v914_v53, %v910_v55 }
 0x4f4   : > { %v916_v57 = vmul.f32 %v915_v56, %v2123_v54  ;;  %v1109_v49 = vadd.f32 %v1108_v46, %v1107_v44  ;;  %v1127_v54 = vld [vmem:[#allocation12 + $0x268] sm:$0xff]  ;;  %v1256_v46 = vld [vmem:[#allocation12 + $0x2f8] sm:$0xff] }
 0x4f5   : > { %v970_v7 = vpop.f32.mrf.mxu1  ;;  %1147 = vmatpush.msrb.mxu1 %v1127_v54  ;;  %v1258_v44 = vld [vmem:[#allocation12 + $0x308] sm:$0xff] }
 0x4f6   : > { %1502 = vmatmul.msk.f32.vlgmr.msra.gmra.mxu0 %vm633_vm5, %v916_v57  ;;  %v1110_v52 = vrot.slane %v1109_v49, 1  ;;  %v1126_v57 = vld [vmem:[#allocation12 + $0x260] sm:$0xff]  ;;  %1275 = vmatpush.msrb.mxu3 %v1258_v44 }
 0x4f7   : > { %1148 = vmatpush.msrb.mxu1 %v1126_v57 }
 0x4f8   : > { %v1111_v55 = vadd.f32 %v1110_v52, %v1109_v49  ;;  %1276 = vmatpush.msrb.mxu3 %v1257_v45  ;;  %v1253_v49 = vld [vmem:[#allocation12 + $0x2e0] sm:$0xff] }
 0x4f9   : > { %v997_v6 = vpop.f32.mrf.mxu2  ;;  %1192 = vmatpush.msra.mxu1 %v1176_v63 }
 0x4fa   : > { %v1000_v8 = vperm.slane %v997_v6, 0  ;;  %v1112_v59 = vmul.f32 0.05, %v1111_v55  ;;  %1277 = vmatpush.msrb.mxu3 %v1256_v46 }
 0x4fb   : > { %1193 = vmatpush.msra.mxu1 %v1175_v0 }
 0x4fc   : > { %1507 = vmatmul.msk.f32.vlgmr.msrb.gmra.mxu1 %vm633_vm5, %v1112_v59  ;;  %1278 = vmatpush.msrb.mxu3 %v1255_v47 }
 0x4fd   : > { %1194 = vmatpush.msra.mxu1 %v1174_v3 }
 0x4fe   : > { %1279 = vmatpush.msrb.mxu3 %v1254_v48 }
 0x4ff   : > { %1195 = vmatpush.msra.mxu1 %v1173_v37 }
 0x500   : > { %1280 = vmatpush.msrb.mxu3 %v1253_v49 }
 0x573   : > { %v947_v9 = vpop.f32.mrf.mxu0  ;;  %v1170_v26 = vpop.f32.mrf.mxu2 }
 0x574   : > { %v971_v10 = vadd.f32 %v970_v7, %v947_v9 }
 0x576   : > { %v1001_v12 = vadd.f32 %v1000_v8, %v971_v10  ;;  %v1098_v10 = vld [vmem:[%s2215_s4] sm:$0xff] }
 0x578   : > { %v1004_v13 = vadd.f32 %v1629_v11, %v1001_v12 }
 0x579   : > { %v1150_v22 = vpop.f32.mrf.mxu1 }
 0x57a   : > { %v1006_v14 = vand.u32 2147483647, %v1004_v13  ;;  %v1005_v18 = vmax.f32 %v1004_v13, 0.0 }
 0x57c   : > { %v1007_v60 = vsub.f32 0.0, %v1006_v14 }
 0x57e   : > { %v1008_v61 = vmul.f32 1.442695, %v1007_v60 }
 0x580   : > { %1634 = vpow2.f32 %v1008_v61 }
 0x586   : > { %v1635_v15 = vpop.eup %1634 }
 0x587   : > { %v1010_v16 = vadd.f32 1.0, %v1635_v15 }
 0x589   : > { %1636 = vlog2.f32 %v1010_v16 }
 0x58f   : > { %v1637_v17 = vpop.eup %1636 }
 0x590   : > { %v1012_v19 = vmul.f32 0.6931472, %v1637_v17 }
 0x592   : > { %v1013_v1 = vadd.f32 %v1012_v19, %v1005_v18  ;;  %v1219_v19 = vld [vmem:[#allocation12 + $0x2d8] sm:$0xff] }
 0x593   : > { %1232 = vmatpush.msra.mxu2 %v1219_v19 }
 0x594   : > { %1505 = vmatmul.msk.f32.vlgmr.msra.gmra.mxu3 %vm767_vm9, %v1013_v1  ;;  %v1218_v1 = vld [vmem:[#allocation12 + $0x2d0] sm:$0xff] }
 0x595   : > { %1233 = vmatpush.msra.mxu2 %v1218_v1 }
 0x597   : > { %1234 = vmatpush.msra.mxu2 %v1217_v20 }
 0x599   : > { %1235 = vmatpush.msra.mxu2 %v1216_v21 }
 0x59b   : > { %1236 = vmatpush.msra.mxu2 %v1215_v23 }
 0x59d   : > { %1237 = vmatpush.msra.mxu2 %v1214_v24 }
 0x59f   : > { %1238 = vmatpush.msra.mxu2 %v1213_v25 }
 0x5a1   : > { %1239 = vmatpush.msra.mxu2 %v1212_v27 }
 0x617   : > { %v1044_v29 = vpop.f32.mrf.mxu3 }
 0x618   : > { %v1045_v58 = vadd.f32 %v1630_v28, %v1044_v29  ;;  %v1171_v28 = vadd.f32 %v1170_v26, %v1150_v22 }
 0x61a   : > { %v1048_v30 = vand.u32 2147483647, %v1045_v58  ;;  %v1047_v36 = vmax.f32 %v1045_v58, 0.0  ;;  %v1201_v58 = vld [vmem:[%s2218_s7 + $0x9] sm:$0x1] }
 0x61c   : > { %v1049_v31 = vsub.f32 0.0, %v1048_v30 }
 0x61e   : > { %v1050_v32 = vmul.f32 1.442695, %v1049_v31 }
 0x620   : > { %1638 = vpow2.f32 %v1050_v32 }
 0x626   : > { %v1639_v33 = vpop.eup %1638 }
 0x627   : > { %v1052_v34 = vadd.f32 1.0, %v1639_v33 }
 0x629   : > { %1640 = vlog2.f32 %v1052_v34 }
 0x62f   : > { %v1641_v35 = vpop.eup %1640 }
 0x630   : > { %v1054_v38 = vmul.f32 0.6931472, %v1641_v35 }
 0x632   : > { %v1055_v39 = vadd.f32 %v1054_v38, %v1047_v36 }
 0x634   : > { %1506 = vmatmul.msk.f32.vlgmr.msrb.gmra.mxu0 %vm767_vm9, %v1055_v39 }
 0x6b1   : > { %v1086_v53 = vpop.f32.mrf.mxu0 }
 0x6b2   : > { %v1087_v56 = vadd.f32 %v1631_v50, %v1086_v53  ;;  %v1220_v50 = vld [vmem:[%s2218_s7 + $0xa] sm:$0x1] }
 0x6b4   : > { %v1090_v62 = vand.u32 2147483647, %v1087_v56  ;;  %v1089_v8 = vmax.f32 %v1087_v56, 0.0 }
 0x6b6   : > { %v1091_v2 = vsub.f32 0.0, %v1090_v62 }
 0x6b8   : > { %v1092_v4 = vmul.f32 1.442695, %v1091_v2  ;;  %v1261_v2 = vld [vmem:[%s2218_s7 + $0xb] sm:$0x1] }
 0x6ba   : > { %1642 = vpow2.f32 %v1092_v4 }
 0x6c0   : > { %v1643_v5 = vpop.eup %1642 }
 0x6c1   : > { %v1094_v6 = vadd.f32 1.0, %v1643_v5 }
 0x6c3   : > { %1644 = vlog2.f32 %v1094_v6 }
 0x6c9   : > { %v1645_v7 = vpop.eup %1644 }
 0x6ca   : > { %v1096_v9 = vmul.f32 0.6931472, %v1645_v7 }
 0x6cc   : > { %v1097_v11 = vadd.f32 %v1096_v9, %v1089_v8 }
 0x6ce   : > { %v1099_v12 = vadd.f32 %v1098_v10, %v1097_v11  ;;  %v1114_v13 = vsel %vm633_vm5, %v1097_v11, 0.0 }
 0x6cf   : > { %v1115_v14 = vrot.slane %v1114_v13, 4 }
 0x6d0   : > { %1100 = vst.msk [vmem:[#allocation15] sm:$0xff] %vm633_vm5, %v1099_v12  ;;  %v1294_v12 = vld [vmem:[%s2216_s5] sm:$0x1] }
 0x6d1   : > { %v1116_v60 = vadd.f32 %v1115_v14, %v1114_v13 }
 0x6d3   : > { %v1117_v61 = vrot.slane %v1116_v60, 2 }
 0x6d5   : > { %v1118_v15 = vadd.f32 %v1117_v61, %v1116_v60 }
 0x6d7   : > { %v1119_v16 = vrot.slane %v1118_v15, 1 }
 0x6d9   : > { %v1120_v17 = vadd.f32 %v1119_v16, %v1118_v15 }
 0x6db   : > { %v1121_v18 = vmul.f32 0.125, %v1120_v17 }
 0x6dd   : > { %1509 = vmatmul.msk.f32.vlgmr.msra.gmra.mxu1 %vm633_vm5, %v1121_v18 }
 0x75a   : > { %v1197_v29 = vpop.f32.mrf.mxu1 }
 0x75b   : > { %v1200_v30 = vadd.f32 %v1197_v29, %v1171_v28 }
 0x75d   : > { %v1202_v31 = vadd.f32 %v1201_v58, %v1200_v30 }
 0x75f   : > { %v1204_v32 = vand.u32 2147483647, %v1202_v31  ;;  %v1203_v39 = vmax.f32 %v1202_v31, 0.0 }
 0x761   : > { %v1205_v33 = vsub.f32 0.0, %v1204_v32 }
 0x763   : > { %v1206_v34 = vmul.f32 1.442695, %v1205_v33 }
 0x765   : > { %1646 = vpow2.f32 %v1206_v34 }
 0x76b   : > { %v1647_v35 = vpop.eup %1646 }
 0x76c   : > { %v1208_v36 = vadd.f32 1.0, %v1647_v35 }
 0x76e   : > { %1648 = vlog2.f32 %v1208_v36 }
 0x774   : > { %v1649_v38 = vpop.eup %1648 }
 0x775   : > { %v1210_v40 = vmul.f32 0.6931472, %v1649_v38 }
 0x777   : > { %v1211_v41 = vadd.f32 %v1210_v40, %v1203_v39 }
 0x779   : > { %1510 = vmatmul.msk.f32.vlgmr.msra.gmra.mxu2 %vm767_vm9, %v1211_v41 }
 0x7fc   : > { %v1241_v51 = vpop.f32.mrf.mxu2 }
 0x7fd   : > { %v1242_v52 = vadd.f32 %v1241_v51, %v1220_v50 }
 0x7ff   : > { %v1245_v53 = vand.u32 2147483647, %v1242_v52  ;;  %v1244_v62 = vmax.f32 %v1242_v52, 0.0 }
 0x801   : > { %v1246_v54 = vsub.f32 0.0, %v1245_v53 }
 0x803   : > { %v1247_v55 = vmul.f32 1.442695, %v1246_v54 }
 0x805   : > { %1650 = vpow2.f32 %v1247_v55 }
 0x80b   : > { %v1651_v56 = vpop.eup %1650 }
 0x80c   : > { %v1249_v57 = vadd.f32 1.0, %v1651_v56 }
 0x80e   : > { %1652 = vlog2.f32 %v1249_v57 }
 0x814   : > { %v1653_v59 = vpop.eup %1652 }
 0x815   : > { %v1251_v63 = vmul.f32 0.6931472, %v1653_v59 }
 0x817   : > { %v1252_v0 = vadd.f32 %v1251_v63, %v1244_v62 }
 0x819   : > { %1511 = vmatmul.msk.f32.vlgmr.msrb.gmra.mxu3 %vm767_vm9, %v1252_v0 }
 0x89c   : > { %v1282_v3 = vpop.f32.mrf.mxu3 }
 0x89d   : > { %v1283_v4 = vadd.f32 %v1282_v3, %v1261_v2 }
 0x89f   : > { %v1286_v37 = vand.u32 2147483647, %v1283_v4  ;;  %v1285_v10 = vmax.f32 %v1283_v4, 0.0 }
 0x8a1   : > { %v1287_v5 = vsub.f32 0.0, %v1286_v37 }
 0x8a3   : > { %v1288_v6 = vmul.f32 1.442695, %v1287_v5 }
 0x8a5   : > { %1654 = vpow2.f32 %v1288_v6 }
 0x8ab   : > { %v1655_v7 = vpop.eup %1654 }
 0x8ac   : > { %v1290_v8 = vadd.f32 1.0, %v1655_v7 }
 0x8ae   : > { %1656 = vlog2.f32 %v1290_v8 }
 0x8b4   : > { %v1657_v9 = vpop.eup %1656 }
 0x8b5   : > { %v1292_v11 = vmul.f32 0.6931472, %v1657_v9 }
 0x8b7   : > { %v1293_v13 = vadd.f32 %v1292_v11, %v1285_v10 }
 0x8b9   : > { %v1295_v14 = vadd.f32 %v1294_v12, %v1293_v13 }
 0x8bb   : > { %1297 = vst.msk [vmem:[#allocation17] sm:$0x1] %vm1296_vm1, %v1295_v14 }
 0x8bc PF: > { %s1325_s30 = sshll.u32 %s2220_s9, 4  ;;  %s1857_s28 = smov [#allocation15]   ;;  %s1326_s30 = int_to_ptr.hbm [resolvable:$true] %s1325_s30 }
 0x8bd   : > { %s1323_s23 = sshll.u32 %s1857_s28, 4  ;;  %p2240_p11 = scmp.eq.s32.totalorder %s1938_s20, 2  ;;  %s1324_s23 = int_to_ptr.vmem [resolvable:$true] %s1323_s23 }
 0x8be   : > { %s1309_s24 = scalar_lea.hbm %s2219_s8, %s1483_s15  ;;  %s1311_s11 = sshll.u32 %s2037_s2, 4  ;;  %s1312_s11 = int_to_ptr.vmem [resolvable:$true] %s1311_s11 }
 0x8bf   : > { %1528 = dma.vmem_to_hbm [thread:$0]  (%p2240_p11), %s1324_s23, 128, %s1326_s30, [#allocation16]  }
 0x8c0   : > { %s1313_s29 = sshll.u32 %s1309_s24, 4  ;;  %s1299_s26 = scalar_lea.sflag [#allocation11], %s2007_s17  ;;  %s1314_s29 = int_to_ptr.hbm [resolvable:$true] %s1313_s29 }
 0x8c1   : > { %s1760_s25 = sshra.s32 %s1314_s29, 4  ;;  %s1766_s30 = scalar_lea.hbm %s2219_s8, 24  ;;  %s1761_s25 = int_to_ptr.hbm [resolvable:$true] %s1760_s25 }
 0x8c2   : > { %s1762_s19 = scalar_lea.hbm %s1761_s25, 8  ;;  %p1767_p9 = scmp.lt.s32.totalorder %s1761_s25, %s2219_s8 }
 0x8c3   : > { %p1763_p12 = scmp.ne.s32.totalorder %s1761_s25, %s1762_s19  ;;  %p1768_p10 = scmp.lt.s32.totalorder %s1766_s30, %s1762_s19 }
 0x8c5   : > { %p1764_p8 = pnand %p1763_p12, %p1976_p13  ;;  %p1769_p0 = por %p1768_p10, %p1767_p9 }
 0x8c7   : > { %p1765_p7 = pneg %p1764_p8 }
 0x8c9   : > { %p1770_p2 = pnand %p1769_p0, %p1765_p7 }
 0x8cb   : > { %1773 = shalt.err (!%p1770_p2)
}
 0x8cc   : > { %1526 = dma.vmem_to_hbm [thread:$0]  (%p1976_p13), %s1312_s11, 128, %s1314_s29, %s1299_s26  }
 0x8cd   : > { %s1858_s2 = smov [#allocation17]   ;;  %s1337_s21 = sshll.u32 %s2221_s10, 4  ;;  %s1338_s21 = int_to_ptr.hbm [resolvable:$true] %s1337_s21 }
 0x8ce   : > { %s1335_s17 = sshll.u32 %s1858_s2, 4  ;;  %p2241_p6 = pmov %p2240_p11  ;;  %s1336_s17 = int_to_ptr.vmem [resolvable:$true] %s1335_s17 }
 0x8d0   : > { %1530 = dma.vmem_to_hbm [thread:$0]  (%p2241_p6), %s1336_s17, 16, %s1338_s21, [#allocation16]  }
 0x8d1   : > { %p2242_p3 = pmov %p2241_p6 }
 0x8d3   : > { %1827 = dma.done.wait (%p2242_p3), [#allocation16], 144   ;;  %p2243_p1 = pmov %p2242_p3 }
 0x8d5   : > { %1829 = vsyncadd (%p2243_p1), [#allocation16], 4294967152 }
 0x8d6 PF: > { %p1555_p13 = scmp.ge.s32.totalorder %s1848_s16, 2  ;;  %s1359_s0 = sand.u32 1, %s1836_s13  }
 0x8d7   : > { %s1360_s12 = scalar_lea.sflag [#allocation11], %s1359_s0 }
 0x8d8   : > { %p1545_p4 = pnand %p1555_p13, %p1981_p5 }
 0x8da   : > { %p1546_p11 = pneg %p1545_p4 }
 0x8dc   : > { %1831 = dma.done.wait (%p1546_p11), %s1360_s12, 128  }
 0x8dd   : > { %1833 = vsyncadd (%p1546_p11), %s1360_s12, 4294967168  ;;  %s2244_s24 = sld [smem:[#allocation22_spill]]  ;;  %p26_p12 = scmp.ge.s32.totalorder %s1954_s27, 5  }
 0x8de   : > { %s2245_s15 = sld [smem:[#allocation23_spill]]  ;;  %s2246_s13 = smov %s1840_s14 }
 0x8df   : > { %s2248_s16 = smov %s1954_s27  ;;  %28 = sbr.rel (!%p26_p12) target bundleno = 11 (0xb), region = 134 }
 0x8e3   : > { %s2247_s14 = smov %s2244_s24 }
 0x8e4   :  { %1366 = vsyncpa [#allocation10], 1 }
 0x8e5   :  { %1368 = vsyncpa [#allocation10 + $0x1], 1 }
 0x8e6   :  { %1369 = vsyncpa [#allocation13], 1 }
 0x8e7   :  { %1370 = vsyncpa [#allocation11], 1 }
 0x8e8   :  { %1372 = vsyncpa [#allocation11 + $0x1], 1 }
 0x8e9   :  { %1373 = vsyncpa [#allocation16], 1 }

</bundles_post_ra>
